<compile_context>
chip_gen: v7x
topology: tpu7x:2x2x1
jax: 0.10.0
libtpu: 0.0.40
codegen_flags: <defaults>
</compile_context>

<pallas_src>
import functools
import math

import jax
import jax.numpy as jnp
from jax.experimental import pallas as pl
from jax.experimental.pallas import tpu as pltpu


def _round_up(x, m):
    return ((x + m - 1) // m) * m


def _gat_kernel(blk_ref, s1_ref, s2_ref, h_ref, adj_ref, out_ref, m_sc, l_sc, *,
                slope, mxu_dtype, score_dtype):
    i = pl.program_id(0)
    j = pl.program_id(1)
    nj = pl.num_programs(1)
    neg_big = jnp.float32(-1e30)

    @pl.when(j == 0)
    def _init():
        m_sc[...] = jnp.full_like(m_sc, neg_big)
        l_sc[...] = jnp.zeros_like(l_sc)
        out_ref[...] = jnp.zeros_like(out_ref)

    # Skip column tiles that contain no edges for this row block (flags prefetched
    # into SMEM).  Skipping is exact: empty tiles contribute exp(-1e30-..)=0.
    @pl.when(blk_ref[i * nj + j] != 0)
    def _compute():
        # e_ij = LeakyReLU(s1_i + s2_j); max(e, slope*e) == LeakyReLU for 0<slope<1
        e = s1_ref[...] + s2_ref[...]                                 # (TM, TN) f32
        e = jnp.maximum(e, slope * e)
        masked_e = jnp.where(adj_ref[...] != 0, e, neg_big)

        # online (flash-style) softmax across column tiles
        m_prev = m_sc[...]
        m_new = jnp.maximum(m_prev, jnp.max(masked_e, axis=1, keepdims=True))
        # Rows with no edge seen yet have m_new == -1e30; reference the exponent
        # to 0 there so exp underflows to exactly 0.  Real attention logits never
        # approach -5e29, so this threshold cannot misfire.
        m_safe = jnp.where(m_new <= neg_big * 0.5, 0.0, m_new)

        alpha = jnp.exp(m_prev - m_safe)                              # (TM, 1)
        p = jnp.exp((masked_e - m_safe).astype(score_dtype))          # (TM, TN)

        l_sc[...] = alpha * l_sc[...] + jnp.sum(
            p.astype(jnp.float32), axis=1, keepdims=True)
        out_ref[...] = alpha * out_ref[...] + jnp.dot(
            p.astype(mxu_dtype), h_ref[...],
            preferred_element_type=jnp.float32)
        m_sc[...] = m_new

    @pl.when(j == nj - 1)
    def _finalize():
        denom = l_sc[...] + 1e-16
        # one per-row EUP reciprocal (+2 Newton-Raphson steps) instead of per-edge divides
        inv = pl.reciprocal(denom, approx=True)
        inv = inv * (2.0 - denom * inv)
        inv = inv * (2.0 - denom * inv)
        out_ref[...] = out_ref[...] * inv


def gat_one_head(x, w, a, adj_mask, *, slope=0.2, block_rows=256, block_cols=512,
                 mxu_dtype=jnp.bfloat16, score_dtype=jnp.float32,
                 vmem_limit_bytes=48 * 1024 * 1024):
    """Single-head sparse-GAT forward (eval-mode dropout).

    x: (N, F_in) f32, w: (F_in, F_out) f32, a: (1, 2*F_out) f32,
    adj_mask: (N, N), nonzero == edge (row = target i, col = source j).
    Returns (N, F_out) f32.

    mxu_dtype:   dtype of MXU operands (h and attention probs); bf16 is 2-4x
                 faster on v5e/v6e/v7x, f32 keeps ~1e-5 agreement with an f32
                 reference.  Accumulation is f32 either way.
    score_dtype: dtype of the exp() argument/probs; bf16 doubles EUP/VPU
                 throughput on v6e/v7x (keep f32 on v5e: no bf16 VPU/EUP).
    """
    n, f_in = x.shape
    f_out = w.shape[1]
    assert block_rows % 128 == 0 and block_cols % 128 == 0

    f_pad = _round_up(f_out, 128)                 # lane-dense MXU results / stores
    tm = min(block_rows, _round_up(n, 128))
    tn = min(block_cols, _round_up(n, 128))
    n_rows = _round_up(n, tm)
    n_cols = _round_up(n, tn)
    n_i, n_j = n_rows // tm, n_cols // tn

    # h / s1 / s2 computed once (f32) instead of per row block in-kernel.
    xf = x.astype(jnp.float32)
    h = xf @ w.astype(jnp.float32)                                    # (N, F_out)
    s1 = h @ a[0, :f_out].astype(jnp.float32)                         # (N,)
    s2 = h @ a[0, f_out:].astype(jnp.float32)                         # (N,)

    # Zero padding is exact: padded nodes have no edges and padded feature
    # columns are zero, so real outputs are unchanged.
    h_p = jnp.zeros((n_cols, f_pad), mxu_dtype).at[:n, :f_out].set(h.astype(mxu_dtype))
    s1_p = jnp.zeros((n_rows, 1), jnp.float32).at[:n, 0].set(s1)
    s2_p = jnp.zeros((1, n_cols), jnp.float32).at[0, :n].set(s2)
    adj_p = jnp.zeros((n_rows, n_cols), jnp.int8).at[:n, :n].set(
        (adj_mask != 0).astype(jnp.int8))

    # per-(row block, col block) nonzero flags, scalar-prefetched into SMEM (1D
    # to avoid 2D SMEM lane padding).
    blk_flags = jnp.any(adj_p.reshape(n_i, tm, n_j, tn) != 0,
                        axis=(1, 3)).astype(jnp.int32).reshape(n_i * n_j)

    kernel = functools.partial(_gat_kernel, slope=slope, mxu_dtype=mxu_dtype,
                               score_dtype=score_dtype)
    out = pl.pallas_call(
        kernel,
        out_shape=jax.ShapeDtypeStruct((n_rows, f_pad), jnp.float32),
        grid_spec=pltpu.PrefetchScalarGridSpec(
            num_scalar_prefetch=1,
            grid=(n_i, n_j),
            in_specs=[
                pl.BlockSpec((tm, 1), lambda i, j, blk: (i, 0)),       # s1 (rows)
                pl.BlockSpec((1, tn), lambda i, j, blk: (0, j)),       # s2 (cols)
                pl.BlockSpec((tn, f_pad), lambda i, j, blk: (j, 0)),   # h (cols)
                pl.BlockSpec((tm, tn), lambda i, j, blk: (i, j)),      # adj (int8)
            ],
            out_specs=pl.BlockSpec((tm, f_pad), lambda i, j, blk: (i, 0)),
            scratch_shapes=[pltpu.VMEM((tm, 1), jnp.float32),    # running row max
                            pltpu.VMEM((tm, 1), jnp.float32)],   # running denom
        ),
        compiler_params=pltpu.CompilerParams(
            dimension_semantics=("parallel", "arbitrary"),
            vmem_limit_bytes=vmem_limit_bytes,
        ),
    )(blk_flags, s1_p, s2_p, h_p, adj_p)
    return out[:n, :f_out]


def _reference_sparse(x, w, a, edge0, edge1, n):
    """Pure-JAX replica of the PyTorch sparse forward (segment ops)."""
    f_out = w.shape[1]
    h = x @ w
    a1 = a[0, :f_out]
    a2 = a[0, f_out:]
    alpha = h[edge0] @ a1 + h[edge1] @ a2
    alpha = jnp.where(alpha > 0, alpha, 0.2 * alpha)
    m = jax.ops.segment_max(alpha, edge0, num_segments=n)
    out_e = jnp.exp(alpha - m[edge0])
    den = jax.ops.segment_sum(out_e, edge0, num_segments=n)
    att = out_e / (den[edge0] + 1e-16)
    return jax.ops.segment_sum(att[:, None] * h[edge1], edge0, num_segments=n)


def _xavier_normal(key, shape, gain):
    fan_out, fan_in = shape[0], shape[1]
    std = gain * math.sqrt(2.0 / (fan_in + fan_out))
    return std * jax.random.normal(key, shape, dtype=jnp.float32)


if __name__ == "__main__":
    N, F_IN, F_OUT = 32, 16, 8

    key = jax.random.PRNGKey(0)
    k_x, k_w, k_a = jax.random.split(key, 3)

    x = jax.random.normal(k_x, (N, F_IN), dtype=jnp.float32)

    gain = math.sqrt(2.0)  # calculate_gain('relu')
    weight = _xavier_normal(k_w, (F_IN, F_OUT), gain)
    a = _xavier_normal(k_a, (1, 2 * F_OUT), gain)

    # deterministic edge list (includes self loops -> every row has >= 1 edge)
    rows = jnp.arange(N, dtype=jnp.int32)
    edge0 = jnp.concatenate([rows, rows, rows])                        # targets
    edge1 = jnp.concatenate([rows, (rows + 1) % N, (rows + 3) % N])    # sources
    adj_mask = jnp.zeros((N, N), dtype=jnp.int8).at[edge0, edge1].set(1)

    ref = _reference_sparse(x, weight, a, edge0, edge1, N)

    # exact-ish path (f32 MXU operands) -> tight agreement with the reference
    out_f32 = gat_one_head(x, weight, a, adj_mask, slope=0.2,
                           mxu_dtype=jnp.float32)
    out_f32 = jax.block_until_ready(out_f32)
    assert out_f32.shape == (N, F_OUT) and out_f32.dtype == jnp.float32
    assert jnp.allclose(out_f32, ref, rtol=1e-5, atol=1e-5), "f32 path mismatch"

    # fast path (bf16 MXU operands, f32 accumulation) -> looser tolerance
    out_bf16 = gat_one_head(x, weight, a, adj_mask, slope=0.2)
    out_bf16 = jax.block_until_ready(out_bf16)
    assert out_bf16.shape == (N, F_OUT)
    assert jnp.allclose(out_bf16, ref, rtol=5e-2, atol=5e-2), "bf16 path mismatch"

    print("KERNEL_OK")
</pallas_src>

<mosaic_0001>
module attributes {stable_mosaic.version = 11 : i64} {
  func.func @_gat_kernel(%arg0: i32, %arg1: i32, %arg2: memref<1xi32, #tpu.memory_space<smem>>, %arg3: memref<128x1xf32, #tpu.memory_space<vmem>>, %arg4: memref<1x128xf32, #tpu.memory_space<vmem>>, %arg5: memref<128x128xf32, #tpu.memory_space<vmem>>, %arg6: memref<128x128xi8, #tpu.memory_space<vmem>>, %arg7: memref<128x128xf32, #tpu.memory_space<vmem>>, %arg8: memref<128x1xf32, #tpu.memory_space<vmem>>, %arg9: memref<128x1xf32, #tpu.memory_space<vmem>>) attributes {dimension_semantics = [#tpu.dimension_semantics<parallel>, #tpu.dimension_semantics<arbitrary>], iteration_bounds = array<i64: 1, 1>, scalar_prefetch = 1 : i64, scratch_operands = 2 : i64, tpu.core_type = #tpu.core_type<tc>, window_params = [{transform_indices = @transform_0, window_bounds = array<i64: 128, 1>}, {transform_indices = @transform_1, window_bounds = array<i64: 1, 128>}, {transform_indices = @transform_2, window_bounds = array<i64: 128, 128>}, {transform_indices = @transform_3, window_bounds = array<i64: 128, 128>}, {transform_indices = @transform_4, window_bounds = array<i64: 128, 128>}]} {
    %c0_i32 = arith.constant 0 : i32
    %0 = arith.cmpi eq, %arg1, %c0_i32 : i32
    %1 = arith.extui %0 : i1 to i32
    %cst = arith.constant -1.000000e+30 : f32
    %c0_i32_0 = arith.constant 0 : i32
    %2 = arith.cmpi ne, %1, %c0_i32_0 : i32
    scf.if %2 {
      %13 = vector.broadcast %cst : f32 to vector<128x1xf32>
      %c0 = arith.constant 0 : index
      %c0_6 = arith.constant 0 : index
      %14 = vector.load %arg8[%c0, %c0_6] : memref<128x1xf32, #tpu.memory_space<vmem>>, vector<128x1xf32>
      tpu.vector_store %arg8[%c0, %c0_6], %13 {strides = array<i32>} : memref<128x1xf32, #tpu.memory_space<vmem>>, vector<128x1xf32>,
      %cst_7 = arith.constant 0.000000e+00 : f32
      %15 = vector.broadcast %cst_7 : f32 to vector<128x1xf32>
      %c0_8 = arith.constant 0 : index
      %c0_9 = arith.constant 0 : index
      %16 = vector.load %arg9[%c0_8, %c0_9] : memref<128x1xf32, #tpu.memory_space<vmem>>, vector<128x1xf32>
      tpu.vector_store %arg9[%c0_8, %c0_9], %15 {strides = array<i32>} : memref<128x1xf32, #tpu.memory_space<vmem>>, vector<128x1xf32>,
      %cst_10 = arith.constant 0.000000e+00 : f32
      %17 = vector.broadcast %cst_10 : f32 to vector<128x128xf32>
      %c0_11 = arith.constant 0 : index
      %c0_12 = arith.constant 0 : index
      %18 = vector.load %arg7[%c0_11, %c0_12] : memref<128x128xf32, #tpu.memory_space<vmem>>, vector<128x128xf32>
      tpu.vector_store %arg7[%c0_11, %c0_12], %17 {strides = array<i32>} : memref<128x128xf32, #tpu.memory_space<vmem>>, vector<128x128xf32>,
    } else {
    }
    %c1_i32 = arith.constant 1 : i32
    %3 = arith.muli %arg0, %c1_i32 : i32
    %4 = arith.addi %3, %arg1 : i32
    %5 = arith.index_cast %4 : i32 to index
    %6 = memref.load %arg2[%5] : memref<1xi32, #tpu.memory_space<smem>>
    %c0_i32_1 = arith.constant 0 : i32
    %7 = arith.cmpi ne, %6, %c0_i32_1 : i32
    %8 = arith.extui %7 : i1 to i32
    %cst_2 = arith.constant -1.000000e+30 : f32
    %c0_i32_3 = arith.constant 0 : i32
    %9 = arith.cmpi ne, %8, %c0_i32_3 : i32
    scf.if %9 {
      %c0 = arith.constant 0 : index
      %c0_6 = arith.constant 0 : index
      %13 = vector.load %arg3[%c0, %c0_6] : memref<128x1xf32, #tpu.memory_space<vmem>>, vector<128x1xf32>
      %c0_7 = arith.constant 0 : index
      %c0_8 = arith.constant 0 : index
      %14 = vector.load %arg4[%c0_7, %c0_8] : memref<1x128xf32, #tpu.memory_space<vmem>>, vector<1x128xf32>
      %15 = vector.broadcast %13 : vector<128x1xf32> to vector<128x128xf32>
      %16 = vector.broadcast %14 : vector<1x128xf32> to vector<128x128xf32>
      %17 = arith.addf %15, %16 : vector<128x128xf32>
      %cst_9 = arith.constant 2.000000e-01 : f32
      %18 = vector.broadcast %cst_9 : f32 to vector<128x128xf32>
      %19 = arith.mulf %18, %17 : vector<128x128xf32>
      %20 = arith.maximumf %17, %19 : vector<128x128xf32>
      %c0_10 = arith.constant 0 : index
      %c0_11 = arith.constant 0 : index
      %21 = vector.load %arg6[%c0_10, %c0_11] : memref<128x128xi8, #tpu.memory_space<vmem>>, vector<128x128xi8>
      %c0_i8 = arith.constant 0 : i8
      %22 = vector.broadcast %c0_i8 : i8 to vector<128x128xi8>
      %23 = arith.cmpi ne, %21, %22 : vector<128x128xi8>
      %24 = vector.broadcast %cst_2 : f32 to vector<128x128xf32>
      %25 = arith.select %23, %20, %24 : vector<128x128xi1>, vector<128x128xf32>
      %c0_12 = arith.constant 0 : index
      %c0_13 = arith.constant 0 : index
      %26 = vector.load %arg8[%c0_12, %c0_13] : memref<128x1xf32, #tpu.memory_space<vmem>>, vector<128x1xf32>
      %cst_14 = arith.constant dense<0xFF800000> : vector<128xf32>
      %27 = vector.multi_reduction <maximumf>, %25, %cst_14 [1] : vector<128x128xf32> to vector<128xf32>
      %28 = vector.shape_cast %27 : vector<128xf32> to vector<128x1xf32>
      %29 = arith.maximumf %26, %28 : vector<128x1xf32>
      %cst_15 = arith.constant 5.000000e-01 : f32
      %30 = arith.mulf %cst_2, %cst_15 : f32
      %31 = vector.broadcast %30 : f32 to vector<128x1xf32>
      %32 = arith.cmpf ole, %29, %31 : vector<128x1xf32>
      %cst_16 = arith.constant 0.000000e+00 : f32
      %33 = vector.broadcast %cst_16 : f32 to vector<128x1xf32>
      %34 = arith.select %32, %33, %29 : vector<128x1xi1>, vector<128x1xf32>
      %35 = arith.subf %26, %34 : vector<128x1xf32>
      %36 = math.exp %35 : vector<128x1xf32>
      %37 = vector.broadcast %34 : vector<128x1xf32> to vector<128x128xf32>
      %38 = arith.subf %25, %37 : vector<128x128xf32>
      %39 = math.exp %38 : vector<128x128xf32>
      %c0_17 = arith.constant 0 : index
      %c0_18 = arith.constant 0 : index
      %40 = vector.load %arg9[%c0_17, %c0_18] : memref<128x1xf32, #tpu.memory_space<vmem>>, vector<128x1xf32>
      %41 = arith.mulf %36, %40 : vector<128x1xf32>
      %cst_19 = arith.constant dense<0.000000e+00> : vector<128xf32>
      %42 = vector.multi_reduction <add>, %39, %cst_19 [1] : vector<128x128xf32> to vector<128xf32>
      %43 = vector.shape_cast %42 : vector<128xf32> to vector<128x1xf32>
      %44 = arith.addf %41, %43 : vector<128x1xf32>
      %c0_20 = arith.constant 0 : index
      %c0_21 = arith.constant 0 : index
      %45 = vector.load %arg9[%c0_20, %c0_21] : memref<128x1xf32, #tpu.memory_space<vmem>>, vector<128x1xf32>
      tpu.vector_store %arg9[%c0_20, %c0_21], %44 {strides = array<i32>} : memref<128x1xf32, #tpu.memory_space<vmem>>, vector<128x1xf32>,
      %c0_22 = arith.constant 0 : index
      %c0_23 = arith.constant 0 : index
      %46 = vector.load %arg7[%c0_22, %c0_23] : memref<128x128xf32, #tpu.memory_space<vmem>>, vector<128x128xf32>
      %47 = vector.broadcast %36 : vector<128x1xf32> to vector<128x128xf32>
      %48 = arith.mulf %47, %46 : vector<128x128xf32>
      %c0_24 = arith.constant 0 : index
      %c0_25 = arith.constant 0 : index
      %49 = vector.load %arg5[%c0_24, %c0_25] : memref<128x128xf32, #tpu.memory_space<vmem>>, vector<128x128xf32>
      %cst_26 = arith.constant dense<0.000000e+00> : vector<128x128xf32>
      %50 = tpu.matmul %39, %49, %cst_26 {dimension_numbers = #tpu.dot_dimension_numbers<[1], [0], [0], [1], [0, 0, 1, 1], [], []>} : vector<128x128xf32>, vector<128x128xf32>, vector<128x128xf32> -> vector<128x128xf32>
      %51 = arith.addf %48, %50 : vector<128x128xf32>
      %c0_27 = arith.constant 0 : index
      %c0_28 = arith.constant 0 : index
      %52 = vector.load %arg7[%c0_27, %c0_28] : memref<128x128xf32, #tpu.memory_space<vmem>>, vector<128x128xf32>
      tpu.vector_store %arg7[%c0_27, %c0_28], %51 {strides = array<i32>} : memref<128x128xf32, #tpu.memory_space<vmem>>, vector<128x128xf32>,
      %c0_29 = arith.constant 0 : index
      %c0_30 = arith.constant 0 : index
      %53 = vector.load %arg8[%c0_29, %c0_30] : memref<128x1xf32, #tpu.memory_space<vmem>>, vector<128x1xf32>
      tpu.vector_store %arg8[%c0_29, %c0_30], %29 {strides = array<i32>} : memref<128x1xf32, #tpu.memory_space<vmem>>, vector<128x1xf32>,
    } else {
    }
    %c0_i32_4 = arith.constant 0 : i32
    %10 = arith.cmpi eq, %arg1, %c0_i32_4 : i32
    %11 = arith.extui %10 : i1 to i32
    %c0_i32_5 = arith.constant 0 : i32
    %12 = arith.cmpi ne, %11, %c0_i32_5 : i32
    scf.if %12 {
      %c0 = arith.constant 0 : index
      %c0_6 = arith.constant 0 : index
      %13 = vector.load %arg9[%c0, %c0_6] : memref<128x1xf32, #tpu.memory_space<vmem>>, vector<128x1xf32>
      %cst_7 = arith.constant 1.000000e-16 : f32
      %14 = vector.broadcast %cst_7 : f32 to vector<128x1xf32>
      %15 = arith.addf %13, %14 : vector<128x1xf32>
      %16 = tpu.reciprocal %15 {approx = true} : vector<128x1xf32> -> vector<128x1xf32>
      %17 = arith.mulf %15, %16 : vector<128x1xf32>
      %cst_8 = arith.constant 2.000000e+00 : f32
      %18 = vector.broadcast %cst_8 : f32 to vector<128x1xf32>
      %19 = arith.subf %18, %17 : vector<128x1xf32>
      %20 = arith.mulf %16, %19 : vector<128x1xf32>
      %21 = arith.mulf %15, %20 : vector<128x1xf32>
      %cst_9 = arith.constant 2.000000e+00 : f32
      %22 = vector.broadcast %cst_9 : f32 to vector<128x1xf32>
      %23 = arith.subf %22, %21 : vector<128x1xf32>
      %24 = arith.mulf %20, %23 : vector<128x1xf32>
      %c0_10 = arith.constant 0 : index
      %c0_11 = arith.constant 0 : index
      %25 = vector.load %arg7[%c0_10, %c0_11] : memref<128x128xf32, #tpu.memory_space<vmem>>, vector<128x128xf32>
      %26 = vector.broadcast %24 : vector<128x1xf32> to vector<128x128xf32>
      %27 = arith.mulf %25, %26 : vector<128x128xf32>
      %c0_12 = arith.constant 0 : index
      %c0_13 = arith.constant 0 : index
      %28 = vector.load %arg7[%c0_12, %c0_13] : memref<128x128xf32, #tpu.memory_space<vmem>>, vector<128x128xf32>
      tpu.vector_store %arg7[%c0_12, %c0_13], %27 {strides = array<i32>} : memref<128x128xf32, #tpu.memory_space<vmem>>, vector<128x128xf32>,
    } else {
    }
    return
  }
  func.func @transform_0(%arg0: i32, %arg1: i32, %arg2: memref<1xi32, #tpu.memory_space<smem>>) -> (i32, i32) {
    %c0_i32 = arith.constant 0 : i32
    %c0_i32_0 = arith.constant 0 : i32
    return %arg0, %c0_i32 : i32, i32
  }
  func.func @transform_1(%arg0: i32, %arg1: i32, %arg2: memref<1xi32, #tpu.memory_space<smem>>) -> (i32, i32) {
    %c0_i32 = arith.constant 0 : i32
    %c0_i32_0 = arith.constant 0 : i32
    return %c0_i32, %arg1 : i32, i32
  }
  func.func @transform_2(%arg0: i32, %arg1: i32, %arg2: memref<1xi32, #tpu.memory_space<smem>>) -> (i32, i32) {
    %c0_i32 = arith.constant 0 : i32
    %c0_i32_0 = arith.constant 0 : i32
    return %arg1, %c0_i32 : i32, i32
  }
  func.func @transform_3(%arg0: i32, %arg1: i32, %arg2: memref<1xi32, #tpu.memory_space<smem>>) -> (i32, i32) {
    %c0_i32 = arith.constant 0 : i32
    return %arg0, %arg1 : i32, i32
  }
  func.func @transform_4(%arg0: i32, %arg1: i32, %arg2: memref<1xi32, #tpu.memory_space<smem>>) -> (i32, i32) {
    %c0_i32 = arith.constant 0 : i32
    %c0_i32_0 = arith.constant 0 : i32
    return %arg0, %c0_i32 : i32, i32
  }
}

</mosaic_0001>

<bundles_post_ra>
// kernel: tpu_custom_call.1
= control target key start
LH: loop header
LB: loop body
LE: loop exit
PB: predicated region body
PF: predicated region fallthrough
CT: control target
= control target key end

     0   :  { %11 = vsyncpa [#allocation7], 0  ;;  %s2390_s0 = inlined_call_operand.<no memory space> [shape: s32[1], index: 0, kind: input, shape index: {}]   ;;  %s2391_s1 = inlined_call_operand.vmem [shape: f32[128,1], index: 1, kind: input, shape index: {}]   ;;  %s2392_s2 = inlined_call_operand.vmem [shape: f32[1,128], index: 2, kind: input, shape index: {}]   ;;  %s2393_s3 = inlined_call_operand.vmem [shape: f32[128,128], index: 3, kind: input, shape index: {}]   ;;  %s2394_s4 = inlined_call_operand.hbm [shape: s8[128,128], index: 4, kind: input, shape index: {}]   ;;  %s2395_s5 = inlined_call_operand.hbm [shape: f32[128,128], index: 5, kind: output, shape index: {}]  }
   0x1   :  { %12 = vsyncpa [#allocation8], 0  ;;  %s1662_s18 = smov [#allocation6]   ;;  %s1614_s22 = scalar_lea.hbm %s2394_s4, 512 }
   0x2   :  { %s24_s19 = sshll.u32 %s1662_s18, 4  ;;  %p1615_p0 = scmp.ne.s32.totalorder %s2394_s4, %s1614_s22  ;;  %s25_s19 = int_to_ptr.vmem [resolvable:$true] %s24_s19 }
   0x3   :  { %p1618_p1 = scmp.lt.u32.totalorder %s1614_s22, %s2394_s4 }
   0x5   :  { %p1620_p2 = pnand %p1618_p1, %p1615_p0 }
   0x7   :  { %1623 = shalt.err (!%p1620_p2)
}
   0x8   :  { %s1624_s27 = scalar_lea.vmem %s25_s19, 512  ;;  %p1629_p4 = scmp.lt.s32.totalorder %s25_s19, %s25_s19 }
   0x9   :  { %p1625_p3 = scmp.ne.s32.totalorder %s25_s19, %s1624_s27  ;;  %p1630_p5 = scmp.lt.s32.totalorder %s1624_s27, %s1624_s27 }
   0xb   :  { %p1631_p6 = por %p1630_p5, %p1629_p4 }
   0xd   :  { %p1632_p7 = pnand %p1631_p6, %p1625_p3 }
   0xf   :  { %1635 = shalt.err (!%p1632_p7)
}
  0x10   :  { %s1663_s28 = smov 128   ;;  %s1664_s29 = smov 8  }
  0x11   :  { %30 = dma.hbm_to_vmem [thread:$0]  %s2394_s4, 512, %s25_s19, [#allocation7], %s1663_s28, %s1663_s28, %s1664_s29  }
  0x12   :  { %1658 = dma.done.wait [#allocation7], 512  }
  0x13   :  { %1659 = vsyncadd [#allocation7], 4294966784  ;;  %vm40_vm0 = vcmask 7168   ;;  %v1665_v0 = vmov -1e+30   ;;  %v1666_v1 = vmov 0.0  }
  0x14   :  { %41 = vst.msk [vmem:[#allocation2] sm:$0xff] %vm40_vm0, %v1665_v0  ;;  %42 = vst.msk [vmem:[#allocation2 + $0x8] sm:$0xff] %vm40_vm0, %v1665_v0  ;;  %p1368_p8 = scmp.eq.s32.totalorder %s2390_s0, 0 }
  0x15   :  { %43 = vst.msk [vmem:[#allocation2 + $0x10] sm:$0xff] %vm40_vm0, %v1665_v0  ;;  %44 = vst.msk [vmem:[#allocation2 + $0x18] sm:$0xff] %vm40_vm0, %v1665_v0  ;;  %v96_v2 = vld [vmem:[%s2391_s1 + $0x8] sm:$0xff] (!%p1368_p8)  ;;  %v95_v3 = vld [vmem:[%s2391_s1] sm:$0xff] (!%p1368_p8)  ;;  %v1667_v4 = vmov (!%p1368_p8), 0  }
  0x16   :  { %45 = vst.msk [vmem:[#allocation2 + $0x20] sm:$0xff] %vm40_vm0, %v1665_v0  ;;  %46 = vst.msk [vmem:[#allocation2 + $0x28] sm:$0xff] %vm40_vm0, %v1665_v0  ;;  %1515 = vset.pattern.permute.xlu1 (!%p1368_p8), %v1667_v4  ;;  %1514 = vset.pattern.permute.xlu0 (!%p1368_p8), %v1667_v4  ;;  %v104_v5 = vld [vmem:[%s2391_s1 + $0x48] sm:$0xff] (!%p1368_p8)  ;;  %v103_v6 = vld [vmem:[%s2391_s1 + $0x40] sm:$0xff] (!%p1368_p8) }
  0x17   :  { %47 = vst.msk [vmem:[#allocation2 + $0x30] sm:$0xff] %vm40_vm0, %v1665_v0  ;;  %48 = vst.msk [vmem:[#allocation2 + $0x38] sm:$0xff] %vm40_vm0, %v1665_v0  ;;  %119 = vperm.xlu1 (!%p1368_p8), %1515, %v96_v2   ;;  %114 = vperm.xlu0 (!%p1368_p8), %1514, %v95_v3   ;;  %v105_v7 = vld [vmem:[%s2391_s1 + $0x50] sm:$0xff] (!%p1368_p8)  ;;  %v106_v9 = vld [vmem:[%s2391_s1 + $0x58] sm:$0xff] (!%p1368_p8) }
  0x18   :  { %49 = vst.msk [vmem:[#allocation2 + $0x40] sm:$0xff] %vm40_vm0, %v1665_v0  ;;  %50 = vst.msk [vmem:[#allocation2 + $0x48] sm:$0xff] %vm40_vm0, %v1665_v0  ;;  %v97_v8 = vld [vmem:[%s2391_s1 + $0x10] sm:$0xff] (!%p1368_p8)  ;;  %v98_v10 = vld [vmem:[%s2391_s1 + $0x18] sm:$0xff] (!%p1368_p8) }
  0x19   :  { %51 = vst.msk [vmem:[#allocation2 + $0x50] sm:$0xff] %vm40_vm0, %v1665_v0  ;;  %52 = vst.msk [vmem:[#allocation2 + $0x58] sm:$0xff] %vm40_vm0, %v1665_v0  ;;  %v107_v11 = vld [vmem:[%s2391_s1 + $0x60] sm:$0xff] (!%p1368_p8)  ;;  %v108_v13 = vld [vmem:[%s2391_s1 + $0x68] sm:$0xff] (!%p1368_p8) }
  0x1a   :  { %53 = vst.msk [vmem:[#allocation2 + $0x60] sm:$0xff] %vm40_vm0, %v1665_v0  ;;  %54 = vst.msk [vmem:[#allocation2 + $0x68] sm:$0xff] %vm40_vm0, %v1665_v0  ;;  %v99_v12 = vld [vmem:[%s2391_s1 + $0x20] sm:$0xff] (!%p1368_p8)  ;;  %v100_v14 = vld [vmem:[%s2391_s1 + $0x28] sm:$0xff] (!%p1368_p8) }
  0x1b   :  { %55 = vst.msk [vmem:[#allocation2 + $0x70] sm:$0xff] %vm40_vm0, %v1665_v0  ;;  %56 = vst.msk [vmem:[#allocation2 + $0x78] sm:$0xff] %vm40_vm0, %v1665_v0  ;;  %159 = vperm.xlu1 (!%p1368_p8), %1515, %v104_v5   ;;  %154 = vperm.xlu0 (!%p1368_p8), %1514, %v103_v6   ;;  %v109_v15 = vld [vmem:[%s2391_s1 + $0x70] sm:$0xff] (!%p1368_p8)  ;;  %v110_v17 = vld [vmem:[%s2391_s1 + $0x78] sm:$0xff] (!%p1368_p8) }
  0x1c   :  { %57 = vst.msk [vmem:[#allocation3] sm:$0xff] %vm40_vm0, %v1666_v1  ;;  %58 = vst.msk [vmem:[#allocation3 + $0x8] sm:$0xff] %vm40_vm0, %v1666_v1  ;;  %v101_v16 = vld [vmem:[%s2391_s1 + $0x30] sm:$0xff] (!%p1368_p8)  ;;  %v102_v18 = vld [vmem:[%s2391_s1 + $0x38] sm:$0xff] (!%p1368_p8) }
  0x1d   :  { %59 = vst.msk [vmem:[#allocation3 + $0x10] sm:$0xff] %vm40_vm0, %v1666_v1  ;;  %60 = vst.msk [vmem:[#allocation3 + $0x18] sm:$0xff] %vm40_vm0, %v1666_v1  ;;  %v246_v19 = vld [vmem:[#allocation6] sm:$0xff] (!%p1368_p8)  ;;  %v248_v20 = vld [vmem:[#allocation6 + $0x10] sm:$0xff] (!%p1368_p8) }
  0x1e   :  { %61 = vst.msk [vmem:[#allocation3 + $0x20] sm:$0xff] %vm40_vm0, %v1666_v1  ;;  %62 = vst.msk [vmem:[#allocation3 + $0x28] sm:$0xff] %vm40_vm0, %v1666_v1  ;;  %vm250_vm1 = vnez (!%p1368_p8), %v246_v19  ;;  %vm252_vm2 = vnez (!%p1368_p8), %v248_v20  ;;  %v247_v40 = vld [vmem:[#allocation6 + $0x8] sm:$0xff] (!%p1368_p8)  ;;  %v249_v42 = vld [vmem:[#allocation6 + $0x18] sm:$0xff] (!%p1368_p8) }
  0x1f   :  { %63 = vst.msk [vmem:[#allocation3 + $0x30] sm:$0xff] %vm40_vm0, %v1666_v1  ;;  %64 = vst.msk [vmem:[#allocation3 + $0x38] sm:$0xff] %vm40_vm0, %v1666_v1  ;;  %164 = vperm.xlu1 (!%p1368_p8), %1515, %v105_v7   ;;  %124 = vperm.xlu0 (!%p1368_p8), %1514, %v97_v8   ;;  %v254_v21 = vsel (!%p1368_p8), %vm250_vm1, 16843009, %v1667_v4  ;;  %v256_v23 = vsel (!%p1368_p8), %vm252_vm2, 16843009, %v1667_v4  ;;  %vm251_vm5 = vnez (!%p1368_p8), %v247_v40  ;;  %vm253_vm7 = vnez (!%p1368_p8), %v249_v42 }
  0x20   :  { %65 = vst.msk [vmem:[#allocation3 + $0x40] sm:$0xff] %vm40_vm0, %v1666_v1  ;;  %66 = vst.msk [vmem:[#allocation3 + $0x48] sm:$0xff] %vm40_vm0, %v1666_v1  ;;  %v258_v22 = vunpack.c.0.s8 (!%p1368_p8), %v254_v21  ;;  %v259_v24 = vunpack.c.1.s8 (!%p1368_p8), %v254_v21  ;;  %v266_v25 = vunpack.c.0.s8 (!%p1368_p8), %v256_v23  ;;  %v267_v27 = vunpack.c.1.s8 (!%p1368_p8), %v256_v23  ;;  %v1816_v58 = vld [vmem:[%s2392_s2] ss:$0 sm:$0xff] (!%p1368_p8) }
  0x21   :  { %67 = vst.msk [vmem:[#allocation3 + $0x50] sm:$0xff] %vm40_vm0, %v1666_v1  ;;  %68 = vst.msk [vmem:[#allocation3 + $0x58] sm:$0xff] %vm40_vm0, %v1666_v1  ;;  %v260_v29 = vunpack.c.2.s8 (!%p1368_p8), %v254_v21  ;;  %v268_v30 = vunpack.c.2.s8 (!%p1368_p8), %v256_v23  ;;  %v261_v35 = vunpack.c.3.s8 (!%p1368_p8), %v254_v21  ;;  %v269_v39 = vunpack.c.3.s8 (!%p1368_p8), %v256_v23 }
  0x22   :  { %69 = vst.msk [vmem:[#allocation3 + $0x60] sm:$0xff] %vm40_vm0, %v1666_v1  ;;  %70 = vst.msk [vmem:[#allocation3 + $0x68] sm:$0xff] %vm40_vm0, %v1666_v1  ;;  %v274_v26 = vpack.c.b16 (!%p1368_p8), %v258_v22, %v258_v22  ;;  %v276_v28 = vpack.c.b16 (!%p1368_p8), %v259_v24, %v259_v24  ;;  %v290_v31 = vpack.c.b16 (!%p1368_p8), %v266_v25, %v266_v25  ;;  %v1805_v50 = vsel (!%p1368_p8), %vm251_vm5, 16843009, %v1667_v4 }
  0x23   :  { %71 = vst.msk [vmem:[#allocation3 + $0x70] sm:$0xff] %vm40_vm0, %v1666_v1  ;;  %72 = vst.msk [vmem:[#allocation3 + $0x78] sm:$0xff] %vm40_vm0, %v1666_v1  ;;  %169 = vperm.xlu1 (!%p1368_p8), %1515, %v106_v9   ;;  %129 = vperm.xlu0 (!%p1368_p8), %1514, %v98_v10   ;;  %v292_v33 = vpack.c.b16 (!%p1368_p8), %v267_v27, %v267_v27  ;;  %v278_v36 = vpack.c.b16 (!%p1368_p8), %v260_v29, %v260_v29  ;;  %v1809_v53 = vsel (!%p1368_p8), %vm253_vm7, 16843009, %v1667_v4 }
  0x24   :  { %73 = vst [vmem:[#allocation9] sm:$0xff] %v1666_v1  ;;  %74 = vst [vmem:[#allocation9 + $0x8] sm:$0xff] %v1666_v1  ;;  %v275_v32 = vpack.c.b8 (!%p1368_p8), %v274_v26, %v274_v26  ;;  %v277_v34 = vpack.c.b8 (!%p1368_p8), %v276_v28, %v276_v28  ;;  %v294_v37 = vpack.c.b16 (!%p1368_p8), %v268_v30, %v268_v30  ;;  %v262_v57 = vunpack.c.0.s8 (!%p1368_p8), %v1805_v50 }
  0x25   :  { %75 = vst [vmem:[#allocation9 + $0x10] sm:$0xff] %v1666_v1  ;;  %76 = vst [vmem:[#allocation9 + $0x18] sm:$0xff] %v1666_v1  ;;  %94 = sbr.rel (%p1368_p8) target bundleno = 696 (0x2b8), region = 29  ;;  %v291_v38 = vpack.c.b8 (!%p1368_p8), %v290_v31, %v290_v31  ;;  %v293_v41 = vpack.c.b8 (!%p1368_p8), %v292_v33, %v292_v33  ;;  %v280_v43 = vpack.c.b16 (!%p1368_p8), %v261_v35, %v261_v35  ;;  %v270_v60 = vunpack.c.0.s8 (!%p1368_p8), %v1809_v53  ;;  %v2007_v31 = vld [vmem:[#allocation2] sm:$0xff] (!%p1368_p8) }
  0x26   :  { %77 = vst [vmem:[#allocation9 + $0x20] sm:$0xff] %v1666_v1  ;;  %78 = vst [vmem:[#allocation9 + $0x28] sm:$0xff] %v1666_v1  ;;  %vm306_vm3 = vnez (!%p1368_p8), %v275_v32  ;;  %vm307_vm4 = vnez (!%p1368_p8), %v277_v34  ;;  %v279_v44 = vpack.c.b8 (!%p1368_p8), %v278_v36, %v278_v36  ;;  %v295_v45 = vpack.c.b8 (!%p1368_p8), %v294_v37, %v294_v37 }
  0x27   :  { %79 = vst [vmem:[#allocation9 + $0x30] sm:$0xff] %v1666_v1  ;;  %80 = vst [vmem:[#allocation9 + $0x38] sm:$0xff] %v1666_v1  ;;  %174 = vperm.xlu1 (!%p1368_p8), %1515, %v107_v11   ;;  %134 = vperm.xlu0 (!%p1368_p8), %1514, %v99_v12   ;;  %v322_v46 = vsel (!%p1368_p8), %vm306_vm3, 16843009, %v1667_v4  ;;  %vm314_vm6 = vnez (!%p1368_p8), %v291_v38  ;;  %v296_v47 = vpack.c.b16 (!%p1368_p8), %v269_v39, %v269_v39  ;;  %v323_v48 = vsel (!%p1368_p8), %vm307_vm4, 16843009, %v1667_v4 }
  0x28   :  { %81 = vst [vmem:[#allocation9 + $0x40] sm:$0xff] %v1666_v1  ;;  %82 = vst [vmem:[#allocation9 + $0x48] sm:$0xff] %v1666_v1  ;;  %vm315_vm8 = vnez (!%p1368_p8), %v293_v41  ;;  %v281_v49 = vpack.c.b8 (!%p1368_p8), %v280_v43, %v280_v43  ;;  %v338_v51 = vunpack.c.0.s8 (!%p1368_p8), %v322_v46  ;;  %v330_v52 = vsel (!%p1368_p8), %vm314_vm6, 16843009, %v1667_v4 }
  0x29   :  { %83 = vst [vmem:[#allocation9 + $0x50] sm:$0xff] %v1666_v1  ;;  %84 = vst [vmem:[#allocation9 + $0x58] sm:$0xff] %v1666_v1  ;;  %vm308_vm9 = vnez (!%p1368_p8), %v279_v44  ;;  %v339_v54 = vunpack.c.0.s8 (!%p1368_p8), %v323_v48  ;;  %v331_v55 = vsel (!%p1368_p8), %vm315_vm8, 16843009, %v1667_v4  ;;  %vm316_vm10 = vnez (!%p1368_p8), %v295_v45 }
  0x2a   :  { %85 = vst [vmem:[#allocation9 + $0x60] sm:$0xff] %v1666_v1  ;;  %86 = vst [vmem:[#allocation9 + $0x68] sm:$0xff] %v1666_v1  ;;  %v297_v56 = vpack.c.b8 (!%p1368_p8), %v296_v47, %v296_v47  ;;  %v346_v59 = vunpack.c.0.s8 (!%p1368_p8), %v330_v52  ;;  %vm309_vm11 = vnez (!%p1368_p8), %v281_v49  ;;  %v347_v61 = vunpack.c.0.s8 (!%p1368_p8), %v331_v55 }
  0x2b   :  { %87 = vst [vmem:[#allocation9 + $0x70] sm:$0xff] %v1666_v1  ;;  %88 = vst [vmem:[#allocation9 + $0x78] sm:$0xff] %v1666_v1  ;;  %179 = vperm.xlu1 (!%p1368_p8), %1515, %v108_v13   ;;  %139 = vperm.xlu0 (!%p1368_p8), %1514, %v100_v14   ;;  %v324_v62 = vsel (!%p1368_p8), %vm308_vm9, 16843009, %v1667_v4  ;;  %v332_v63 = vsel (!%p1368_p8), %vm316_vm10, 16843009, %v1667_v4  ;;  %v263_v0 = vunpack.c.1.s8 (!%p1368_p8), %v1805_v50  ;;  %v271_v6 = vunpack.c.1.s8 (!%p1368_p8), %v1809_v53 }
  0x2c   :  { %vm1822_vm12 = vcmp.ne.s32.totalorder %v338_v51, 0  ;;  %vm1826_vm13 = vcmp.ne.s32.totalorder %v339_v54, 0  ;;  %vm317_vm14 = vnez %v297_v56  ;;  %v325_v9 = vsel %vm309_vm11, 16843009, %v1667_v4 }
  0x2d   :  { %v282_v10 = vpack.c.b16 %v262_v57, %v262_v57  ;;  %vm1834_vm15 = vcmp.ne.s32.totalorder %v346_v59, 0  ;;  %v340_v12 = vunpack.c.0.s8 %v324_v62  ;;  %v348_v13 = vunpack.c.0.s8 %v332_v63 }
  0x2e   :  { %v298_v14 = vpack.c.b16 %v270_v60, %v270_v60  ;;  %vm1838_vm1 = vcmp.ne.s32.totalorder %v347_v61, 0  ;;  %v284_v19 = vpack.c.b16 %v263_v0, %v263_v0  ;;  %v341_v22 = vunpack.c.0.s8 %v325_v9 }
  0x2f   :  { %184 = vperm.xlu1 %1515, %v109_v15   ;;  %144 = vperm.xlu0 %1514, %v101_v16   ;;  %v300_v23 = vpack.c.b16 %v271_v6, %v271_v6  ;;  %v264_v24 = vunpack.c.2.s8 %v1805_v50  ;;  %v272_v25 = vunpack.c.2.s8 %v1809_v53  ;;  %v283_v29 = vpack.c.b8 %v282_v10, %v282_v10 }
  0x30   :  { %vm1847_vm2 = vcmp.ne.s32.totalorder %v340_v12, 0  ;;  %v299_v33 = vpack.c.b8 %v298_v14, %v298_v14  ;;  %vm1855_vm3 = vcmp.ne.s32.totalorder %v348_v13, 0  ;;  %v285_v38 = vpack.c.b8 %v284_v19, %v284_v19 }
  0x31   :  { %vm1860_vm4 = vcmp.ne.s32.totalorder %v341_v22, 0  ;;  %v301_v42 = vpack.c.b8 %v300_v23, %v300_v23  ;;  %v286_v43 = vpack.c.b16 %v264_v24, %v264_v24  ;;  %v1864_v44 = vpack.c.b16 %v272_v25, %v272_v25 }
  0x32   :  { %vm310_vm5 = vnez %v283_v29  ;;  %vm1872_vm6 = vnez %v299_v33  ;;  %v265_v52 = vunpack.c.3.s8 %v1805_v50  ;;  %vm311_vm8 = vnez %v285_v38 }
  0x33   :  { %189 = vperm.xlu1 %1515, %v110_v17   ;;  %149 = vperm.xlu0 %1514, %v102_v18   ;;  %v333_v18 = vsel %vm317_vm14, 16843009, %v1667_v4  ;;  %v326_v61 = vsel %vm310_vm5, 16843009, %v1667_v4  ;;  %vm1888_vm9 = vnez %v301_v42  ;;  %v287_v62 = vpack.c.b8 %v286_v43, %v286_v43 }
  0x34   :  { %v349_v32 = vunpack.c.0.s8 %v333_v18  ;;  %v273_v63 = vunpack.c.3.s8 %v1809_v53  ;;  %v334_v3 = vsel %vm1872_vm6, 16843009, %v1667_v4  ;;  %v342_v13 = vunpack.c.0.s8 %v326_v61 }
  0x35   :  { %v350_v14 = vunpack.c.0.s8 %v334_v3  ;;  %vm1912_vm10 = vnez %v287_v62 }
  0x36   :  { %vm1881_vm7 = vcmp.ne.s32.totalorder %v349_v32, 0  ;;  %v304_v24 = vpack.c.b16 %v273_v63, %v273_v63  ;;  %vm358_vm11 = vcmp.ne.s32.totalorder %v342_v13, 0  ;;  %v328_v33 = vsel %vm1912_vm10, 16843009, %v1667_v4 }
  0x96   :  { %v120_v1 = vpop.permute.xlu1 %119  ;;  %v115_v2 = vpop.permute.xlu0 %114 }
  0x97   :  { %v199_v7 = vadd.f32 %v1816_v58, %v120_v1  ;;  %v198_v8 = vadd.f32 %v1816_v58, %v115_v2 }
  0x99   :  { %v215_v15 = vmul.f32 0.2, %v199_v7  ;;  %v214_v16 = vmul.f32 0.2, %v198_v8 }
  0x9a   :  { %v160_v20 = vpop.permute.xlu1 %159  ;;  %v155_v21 = vpop.permute.xlu0 %154 }
  0x9b   :  { %v207_v26 = vadd.f32 %v1816_v58, %v160_v20  ;;  %v206_v27 = vadd.f32 %v1816_v58, %v155_v21  ;;  %v230_v28 = vmax.f32 %v198_v8, %v214_v16  ;;  %v231_v30 = vmax.f32 %v199_v7, %v215_v15 }
  0x9c   :  { %v327_v7 = vsel %vm311_vm8, 16843009, %v1667_v4  ;;  %v288_v8 = vpack.c.b16 %v265_v52, %v265_v52  ;;  %v335_v15 = vsel %vm1888_vm9, 16843009, %v1667_v4  ;;  %v303_v20 = vpack.c.b8 %v1864_v44, %v1864_v44 }
  0x9d   :  { %v223_v34 = vmul.f32 0.2, %v207_v26  ;;  %v222_v35 = vmul.f32 0.2, %v206_v27  ;;  %v1853_v36 = vsel %vm1822_vm12, %v230_v28, -1e+30  ;;  %v343_v28 = vunpack.c.0.s8 %v327_v7 }
  0x9e   :  { %v165_v39 = vpop.permute.xlu1 %164  ;;  %402 = vmax.xlane.f32.xlu0 %v1853_v36  ;;  %v125_v40 = vpop.permute.xlu0 %124  ;;  %v1870_v48 = vsel %vm1826_vm13, %v231_v30, -1e+30  ;;  %v289_v23 = vpack.c.b8 %v288_v8, %v288_v8  ;;  %vm1930_vm12 = vcmp.ne.s32.totalorder %v350_v14, 0  ;;  %v351_v32 = vunpack.c.0.s8 %v335_v15 }
  0x9f   :  { %v208_v45 = vadd.f32 %v1816_v58, %v165_v39  ;;  %v200_v46 = vadd.f32 %v1816_v58, %v125_v40  ;;  %v238_v47 = vmax.f32 %v206_v27, %v222_v35  ;;  %v239_v49 = vmax.f32 %v207_v26, %v223_v34 }
  0xa0   :  { %vm320_vm13 = vnez %v303_v20  ;;  %vm313_vm14 = vnez %v289_v23  ;;  %v305_v40 = vpack.c.b8 %v304_v24, %v304_v24  ;;  %v871_v24 = vld [vmem:[%s2393_s3 + $0x20] sm:$0xff] }
  0xa1   :  { %v224_v54 = vmul.f32 0.2, %v208_v45  ;;  %v216_v55 = vmul.f32 0.2, %v200_v46  ;;  %v1879_v56 = vsel %vm1834_vm15, %v238_v47, -1e+30 }
  0xa2   :  { %v170_v59 = vpop.permute.xlu1 %169  ;;  %404 = vmax.xlane.f32.xlu0 %v1870_v48  ;;  %418 = vmax.xlane.f32.xlu1 %v1879_v56  ;;  %v130_v60 = vpop.permute.xlu0 %129  ;;  %v1900_v5 = vsel %vm1838_vm1, %v239_v49, -1e+30  ;;  %vm359_vm15 = vcmp.ne.s32.totalorder %v343_v28, 0  ;;  %v336_v47 = vsel %vm320_vm13, 16843009, %v1667_v4  ;;  %vm1955_vm1 = vcmp.ne.s32.totalorder %v351_v32, 0 }
  0xa3   :  { %v209_v0 = vadd.f32 %v1816_v58, %v170_v59  ;;  %v201_v1 = vadd.f32 %v1816_v58, %v130_v60  ;;  %v232_v2 = vmax.f32 %v200_v46, %v216_v55  ;;  %v240_v6 = vmax.f32 %v208_v45, %v224_v54  ;;  %v873_v28 = vld [vmem:[%s2393_s3 + $0x30] sm:$0xff] }
  0xa4   :  { %v344_v46 = vunpack.c.0.s8 %v328_v33  ;;  %v329_v54 = vsel %vm313_vm14, 16843009, %v1667_v4 }
  0xa5   :  { %v225_v9 = vmul.f32 0.2, %v209_v0  ;;  %v217_v10 = vmul.f32 0.2, %v201_v1  ;;  %v1905_v53 = vsel %vm1847_vm2, %v232_v2, -1e+30  ;;  %vm321_vm2 = vnez %v305_v40 }
  0xa6   :  { %v175_v11 = vpop.permute.xlu1 %174  ;;  %420 = vmax.xlane.f32.xlu0 %v1900_v5  ;;  %406 = vmax.xlane.f32.xlu1 %v1905_v53  ;;  %v135_v12 = vpop.permute.xlu0 %134  ;;  %v1922_v21 = vsel %vm1855_vm3, %v240_v6, -1e+30  ;;  %vm360_vm3 = vcmp.ne.s32.totalorder %v344_v46, 0  ;;  %v337_v7 = vsel %vm321_vm2, 16843009, %v1667_v4  ;;  %v875_v46 = vld [vmem:[%s2393_s3 + $0x40] sm:$0xff] }
  0xa7   :  { %v210_v17 = vadd.f32 %v1816_v58, %v175_v11  ;;  %v202_v18 = vadd.f32 %v1816_v58, %v135_v12  ;;  %v233_v19 = vmax.f32 %v201_v1, %v217_v10  ;;  %v241_v22 = vmax.f32 %v209_v0, %v225_v9 }
  0xa8   :  { %v352_v0 = vunpack.c.0.s8 %v336_v47  ;;  %v345_v1 = vunpack.c.0.s8 %v329_v54  ;;  %v353_v13 = vunpack.c.0.s8 %v337_v7  ;;  %v876_v47 = vld [vmem:[%s2393_s3 + $0x48] sm:$0xff] }
  0xa9   :  { %v226_v25 = vmul.f32 0.2, %v210_v17  ;;  %v218_v26 = vmul.f32 0.2, %v202_v18  ;;  %v1926_v27 = vsel %vm1860_vm4, %v233_v19, -1e+30 }
  0xaa   :  { %v180_v29 = vpop.permute.xlu1 %179  ;;  %422 = vmax.xlane.f32.xlu0 %v1922_v21  ;;  %408 = vmax.xlane.f32.xlu1 %v1926_v27  ;;  %v140_v30 = vpop.permute.xlu0 %139  ;;  %v1941_v38 = vsel %vm1881_vm7, %v241_v22, -1e+30  ;;  %vm368_vm4 = vcmp.ne.s32.totalorder %v352_v0, 0  ;;  %vm361_vm5 = vcmp.ne.s32.totalorder %v345_v1, 0  ;;  %vm369_vm6 = vcmp.ne.s32.totalorder %v353_v13, 0  ;;  %v869_v19 = vld [vmem:[%s2393_s3 + $0x10] sm:$0xff] }
  0xab   :  { %v211_v34 = vadd.f32 %v1816_v58, %v180_v29  ;;  %v203_v35 = vadd.f32 %v1816_v58, %v140_v30  ;;  %v234_v37 = vmax.f32 %v202_v18, %v218_v26  ;;  %v242_v39 = vmax.f32 %v210_v17, %v226_v25  ;;  %v867_v17 = vld [vmem:[%s2393_s3] sm:$0xff]  ;;  %v868_v18 = vld [vmem:[%s2393_s3 + $0x8] sm:$0xff]  ;;  %v870_v22 = vld [vmem:[%s2393_s3 + $0x18] sm:$0xff] }
  0xac   :  { %v1458_v20 = vpack.c.bf16 %v868_v18, %v867_v17  ;;  %v1462_v23 = vpack.c.bf16 %v870_v22, %v869_v19  ;;  %v872_v25 = vld [vmem:[%s2393_s3 + $0x28] sm:$0xff]  ;;  %v874_v29 = vld [vmem:[%s2393_s3 + $0x38] sm:$0xff] }
  0xad   :  { %v227_v41 = vmul.f32 0.2, %v211_v34  ;;  %v219_v42 = vmul.f32 0.2, %v203_v35  ;;  %v1943_v43 = vsel %vm358_vm11, %v234_v37, -1e+30  ;;  %v1466_v26 = vpack.c.bf16 %v872_v25, %v871_v24 }
  0xae   :  { %v185_v44 = vpop.permute.xlu1 %184  ;;  %424 = vmax.xlane.f32.xlu0 %v1941_v38  ;;  %410 = vmax.xlane.f32.xlu1 %v1943_v43  ;;  %v145_v45 = vpop.permute.xlu0 %144  ;;  %v1953_v55 = vsel %vm1930_vm12, %v242_v39, -1e+30  ;;  %v1470_v30 = vpack.c.bf16 %v874_v29, %v873_v28  ;;  %v878_v0 = vld [vmem:[%s2393_s3 + $0x58] sm:$0xff]  ;;  %v2080_v25 = vld [vmem:[#allocation2 + $0x28] sm:$0xff]  ;;  %v2084_v28 = vld [vmem:[#allocation2 + $0x60] sm:$0xff] }
  0xaf   :  { %v212_v49 = vadd.f32 %v1816_v58, %v185_v44  ;;  %v204_v51 = vadd.f32 %v1816_v58, %v145_v45  ;;  %v235_v52 = vmax.f32 %v203_v35, %v219_v42  ;;  %v243_v57 = vmax.f32 %v211_v34, %v227_v41  ;;  %1459 = vmatprep.subr.bf16.mxu0 %v1458_v20  ;;  %v2010_v34 = vld [vmem:[#allocation2 + $0x40] sm:$0xff]  ;;  %v2012_v35 = vld [vmem:[#allocation2 + $0x8] sm:$0xff]  ;;  %v2020_v44 = vld [vmem:[#allocation2 + $0x10] sm:$0xff] }
  0xb0   :  { %1490 = vmatprep.subr.bf16.mxu1 %v1458_v20  ;;  %1461 = vmatpush3.bf16.msra.mxu0 %v1458_v20  ;;  %v2022_v45 = vld [vmem:[#allocation2 + $0x48] sm:$0xff]  ;;  %v2062_v13 = vld [vmem:[#allocation2 + $0x58] sm:$0xff]  ;;  %v881_v29 = vld [vmem:[%s2393_s3 + $0x70] sm:$0xff] }
  0xb1   :  { %v228_v60 = vmul.f32 0.2, %v212_v49  ;;  %v220_v61 = vmul.f32 0.2, %v204_v51  ;;  %v1959_v50 = vsel %vm359_vm15, %v235_v52, -1e+30  ;;  %1498 = vmatpush3.bf16.msra.mxu1 %v1458_v20  ;;  %1463 = vmatprep.subr.bf16.mxu0 %v1462_v23 }
  0xb2   :  { %v190_v62 = vpop.permute.xlu1 %189  ;;  %426 = vmax.xlane.f32.xlu0 %v1953_v55  ;;  %412 = vmax.xlane.f32.xlu1 %v1959_v50  ;;  %v150_v63 = vpop.permute.xlu0 %149  ;;  %v1968_v8 = vsel %vm1955_vm1, %v243_v57, -1e+30 }
  0xb3   :  { %v213_v2 = vadd.f32 %v1816_v58, %v190_v62  ;;  %v205_v3 = vadd.f32 %v1816_v58, %v150_v63  ;;  %v236_v6 = vmax.f32 %v204_v51, %v220_v61  ;;  %v244_v12 = vmax.f32 %v212_v49, %v228_v60  ;;  %1491 = vmatprep.subr.bf16.mxu1 %v1462_v23  ;;  %v2040_v61 = vld [vmem:[#allocation2 + $0x18] sm:$0xff]  ;;  %v2042_v62 = vld [vmem:[#allocation2 + $0x50] sm:$0xff] }
  0xb4   :  { %1465 = vmatpush3.bf16.msra.mxu0 %v1462_v23  ;;  %v1474_v49 = vpack.c.bf16 %v876_v47, %v875_v46  ;;  %v877_v63 = vld [vmem:[%s2393_s3 + $0x50] sm:$0xff] }
  0xb5   :  { %v229_v9 = vmul.f32 0.2, %v213_v2  ;;  %v221_v10 = vmul.f32 0.2, %v205_v3  ;;  %v1970_v11 = vsel %vm360_vm3, %v236_v6, -1e+30  ;;  %1499 = vmatpush3.bf16.msra.mxu1 %v1462_v23  ;;  %1467 = vmatprep.subr.bf16.mxu0 %v1466_v26  ;;  %v1478_v1 = vpack.c.bf16 %v878_v0, %v877_v63 }
  0xb6   :  { %428 = vmax.xlane.f32.xlu0 %v1968_v8  ;;  %414 = vmax.xlane.f32.xlu1 %v1970_v11  ;;  %v1974_v14 = vsel %vm368_vm4, %v244_v12, -1e+30  ;;  %v2060_v12 = vld [vmem:[#allocation2 + $0x20] sm:$0xff] }
  0xb7   :  { %v237_v58 = vmax.f32 %v205_v3, %v221_v10  ;;  %v245_v15 = vmax.f32 %v213_v2, %v229_v9  ;;  %1492 = vmatprep.subr.bf16.mxu1 %v1466_v26 }
  0xb8   :  { %1469 = vmatpush3.bf16.msra.mxu0 %v1466_v26 }
  0xb9   :  { %v1976_v4 = vsel %vm361_vm5, %v237_v58, -1e+30  ;;  %v1980_v16 = vsel %vm369_vm6, %v245_v15, -1e+30  ;;  %1500 = vmatpush3.bf16.msra.mxu1 %v1466_v26  ;;  %1471 = vmatprep.subr.bf16.mxu0 %v1470_v30  ;;  %v879_v58 = vld [vmem:[%s2393_s3 + $0x60] sm:$0xff]  ;;  %v880_v15 = vld [vmem:[%s2393_s3 + $0x68] sm:$0xff] }
  0xba   :  { %430 = vmax.xlane.f32.xlu0 %v1974_v14  ;;  %416 = vmax.xlane.f32.xlu1 %v1976_v4  ;;  %v1482_v17 = vpack.c.bf16 %v880_v15, %v879_v58 }
  0xbb   :  { %1493 = vmatprep.subr.bf16.mxu1 %v1470_v30 }
  0xbc   :  { %1473 = vmatpush3.bf16.msra.mxu0 %v1470_v30 }
  0xbd   :  { %1501 = vmatpush3.bf16.msra.mxu1 %v1470_v30  ;;  %1475 = vmatprep.subr.bf16.mxu0 %v1474_v49  ;;  %v882_v30 = vld [vmem:[%s2393_s3 + $0x78] sm:$0xff] }
  0xbe   :  { %432 = vmax.xlane.f32.xlu0 %v1980_v16  ;;  %1494 = vmatprep.subr.bf16.mxu1 %v1474_v49 }
  0xc0   :  { %1477 = vmatpush3.bf16.msra.mxu0 %v1474_v49 }
  0xc1   :  { %1502 = vmatpush3.bf16.msra.mxu1 %v1474_v49  ;;  %1479 = vmatprep.subr.bf16.mxu0 %v1478_v1 }
  0xc2   :  { %1495 = vmatprep.subr.bf16.mxu1 %v1478_v1 }
  0xc4   :  { %1481 = vmatpush3.bf16.msra.mxu0 %v1478_v1 }
  0xc5   :  { %1503 = vmatpush3.bf16.msra.mxu1 %v1478_v1  ;;  %1483 = vmatprep.subr.bf16.mxu0 %v1482_v17 }
  0xc6   :  { %1496 = vmatprep.subr.bf16.mxu1 %v1482_v17 }
  0xc8   :  { %1485 = vmatpush3.bf16.msra.mxu0 %v1482_v17 }
  0xc9   :  { %1504 = vmatpush3.bf16.msra.mxu1 %v1482_v17 }
 0x12b   :  { %v403_v32 = vpop.xlane.xlu0 %402 }
 0x12c   :  { %v434_v33 = vmax.f32 %v2007_v31, %v403_v32  ;;  %v1486_v32 = vpack.c.bf16 %v882_v30, %v881_v29 }
 0x12e   :  { %1060 = vst.msk [vmem:[#allocation2] sm:$0xff] %vm40_vm0, %v434_v33  ;;  %vm450_vm7 = vcmp.le.f32.partialorder %v434_v33, -5e+29  ;;  %1487 = vmatprep.subr.bf16.mxu0 %v1486_v32  ;;  %1497 = vmatprep.subr.bf16.mxu1 %v1486_v32 }
 0x12f   :  { %v419_v37 = vpop.xlane.xlu1 %418  ;;  %v405_v39 = vpop.xlane.xlu0 %404  ;;  %v2015_v40 = vsel %vm450_vm7, 0.0, %v434_v33  ;;  %1489 = vmatpush3.bf16.msra.mxu0 %v1486_v32  ;;  %1505 = vmatpush3.bf16.msra.mxu1 %v1486_v32 }
 0x130   :  { %v442_v41 = vmax.f32 %v2010_v34, %v419_v37  ;;  %v435_v42 = vmax.f32 %v2012_v35, %v405_v39  ;;  %532 = vperm.xlu1 %1515, %v2015_v40  }
 0x132   :  { %1068 = vst.msk [vmem:[#allocation2 + $0x40] sm:$0xff] %vm40_vm0, %v442_v41  ;;  %1061 = vst.msk [vmem:[#allocation2 + $0x8] sm:$0xff] %vm40_vm0, %v435_v42  ;;  %vm458_vm8 = vcmp.le.f32.partialorder %v442_v41, -5e+29  ;;  %vm451_vm9 = vcmp.le.f32.partialorder %v435_v42, -5e+29 }
 0x133   :  { %v407_v51 = vpop.xlane.xlu1 %406  ;;  %v421_v52 = vpop.xlane.xlu0 %420  ;;  %v2032_v54 = vsel %vm458_vm8, 0.0, %v442_v41  ;;  %v2034_v57 = vsel %vm451_vm9, 0.0, %v435_v42  ;;  %v482_v41 = vsub.f32 %v2007_v31, %v2015_v40 }
 0x134   :  { %v436_v59 = vmax.f32 %v2020_v44, %v407_v51  ;;  %v443_v60 = vmax.f32 %v2022_v45, %v421_v52  ;;  %572 = vperm.xlu0 %1514, %v2032_v54   ;;  %537 = vperm.xlu1 %1515, %v2034_v57   ;;  %v483_v26 = vsub.f32 %v2012_v35, %v2034_v57  ;;  %v392_v51 = vld [vmem:[#allocation2 + $0x30] sm:$0xff]  ;;  %v2102_v52 = vld [vmem:[#allocation2 + $0x68] sm:$0xff] }
 0x136   :  { %1062 = vst.msk [vmem:[#allocation2 + $0x10] sm:$0xff] %vm40_vm0, %v436_v59  ;;  %1069 = vst.msk [vmem:[#allocation2 + $0x48] sm:$0xff] %vm40_vm0, %v443_v60  ;;  %vm452_vm10 = vcmp.le.f32.partialorder %v436_v59, -5e+29  ;;  %vm459_vm11 = vcmp.le.f32.partialorder %v443_v60, -5e+29 }
 0x137   :  { %v409_v2 = vpop.xlane.xlu1 %408  ;;  %v423_v3 = vpop.xlane.xlu0 %422  ;;  %v2052_v6 = vsel %vm452_vm10, 0.0, %v436_v59  ;;  %v2054_v7 = vsel %vm459_vm11, 0.0, %v443_v60  ;;  %v500_v47 = vmul.f32 1.442695, %v483_v26  ;;  %v498_v60 = vmul.f32 1.442695, %v482_v41 }
 0x138   :  { %v437_v9 = vmax.f32 %v2040_v61, %v409_v2  ;;  %v444_v10 = vmax.f32 %v2042_v62, %v423_v3  ;;  %542 = vperm.xlu0 %1514, %v2052_v6   ;;  %577 = vperm.xlu1 %1515, %v2054_v7   ;;  %v484_v1 = vsub.f32 %v2020_v44, %v2052_v6  ;;  %v393_v3 = vld [vmem:[#allocation2 + $0x38] sm:$0xff] }
 0x139   :  { %1516 = vpow2.f32 %v500_v47 }
 0x13a   :  { %1063 = vst.msk [vmem:[#allocation2 + $0x18] sm:$0xff] %vm40_vm0, %v437_v9  ;;  %1070 = vst.msk [vmem:[#allocation2 + $0x50] sm:$0xff] %vm40_vm0, %v444_v10  ;;  %vm453_vm12 = vcmp.le.f32.partialorder %v437_v9, -5e+29  ;;  %vm460_vm13 = vcmp.le.f32.partialorder %v444_v10, -5e+29  ;;  %1518 = vpow2.f32 %v498_v60 }
 0x13b   :  { %v411_v18 = vpop.xlane.xlu1 %410  ;;  %v425_v19 = vpop.xlane.xlu0 %424  ;;  %v2072_v20 = vsel %vm453_vm12, 0.0, %v437_v9  ;;  %v2074_v22 = vsel %vm460_vm13, 0.0, %v444_v10  ;;  %v2112_v9 = vld [vmem:[#allocation2 + $0x70] sm:$0xff]  ;;  %v490_v10 = vsub.f32 %v2010_v34, %v2032_v54 }
 0x13c   :  { %v438_v23 = vmax.f32 %v2060_v12, %v411_v18  ;;  %v445_v24 = vmax.f32 %v2062_v13, %v425_v19  ;;  %547 = vperm.xlu0 %1514, %v2072_v20   ;;  %582 = vperm.xlu1 %1515, %v2074_v22   ;;  %v502_v19 = vmul.f32 1.442695, %v484_v1  ;;  %v492_v32 = vsub.f32 %v2042_v62, %v2074_v22 }
 0x13d   :  { %v514_v54 = vmul.f32 1.442695, %v490_v10 }
 0x13e   :  { %1064 = vst.msk [vmem:[#allocation2 + $0x20] sm:$0xff] %vm40_vm0, %v438_v23  ;;  %1071 = vst.msk [vmem:[#allocation2 + $0x58] sm:$0xff] %vm40_vm0, %v445_v24  ;;  %vm454_vm14 = vcmp.le.f32.partialorder %v438_v23, -5e+29  ;;  %vm461_vm15 = vcmp.le.f32.partialorder %v445_v24, -5e+29 }
 0x13f   :  { %v413_v33 = vpop.xlane.xlu1 %412  ;;  %v427_v35 = vpop.xlane.xlu0 %426  ;;  %v470_v37 = vsel %vm454_vm14, 0.0, %v438_v23  ;;  %v2094_v39 = vsel %vm461_vm15, 0.0, %v445_v24  ;;  %v485_v23 = vsub.f32 %v2040_v61, %v2072_v20  ;;  %v2124_v24 = vld [vmem:[#allocation2 + $0x78] sm:$0xff]  ;;  %v518_v62 = vmul.f32 1.442695, %v492_v32 }
 0x140   :  { %v439_v42 = vmax.f32 %v2080_v25, %v413_v33  ;;  %v446_v46 = vmax.f32 %v2084_v28, %v427_v35  ;;  %552 = vperm.xlu0 %1514, %v470_v37   ;;  %587 = vperm.xlu1 %1515, %v2094_v39   ;;  %v486_v49 = vsub.f32 %v2060_v12, %v470_v37 }
 0x141   :  { %v504_v33 = vmul.f32 1.442695, %v485_v23  ;;  %v493_v60 = vsub.f32 %v2062_v13, %v2094_v39 }
 0x142   :  { %1065 = vst.msk [vmem:[#allocation2 + $0x28] sm:$0xff] %vm40_vm0, %v439_v42  ;;  %1072 = vst.msk [vmem:[#allocation2 + $0x60] sm:$0xff] %vm40_vm0, %v446_v46  ;;  %vm455_vm1 = vcmp.le.f32.partialorder %v439_v42, -5e+29  ;;  %vm462_vm2 = vcmp.le.f32.partialorder %v446_v46, -5e+29 }
 0x143   :  { %v415_v31 = vpop.xlane.xlu1 %414  ;;  %v429_v40 = vpop.xlane.xlu0 %428  ;;  %v471_v57 = vsel %vm455_vm1, 0.0, %v439_v42  ;;  %v2106_v59 = vsel %vm462_vm2, 0.0, %v446_v46  ;;  %v506_v2 = vmul.f32 1.442695, %v486_v49 }
 0x144   :  { %v440_v63 = vmax.f32 %v392_v51, %v415_v31  ;;  %v447_v0 = vmax.f32 %v2102_v52, %v429_v40  ;;  %557 = vperm.xlu0 %1514, %v471_v57   ;;  %592 = vperm.xlu1 %1515, %v2106_v59   ;;  %v487_v35 = vsub.f32 %v2080_v25, %v471_v57  ;;  %v2138_v37 = vpop.eup %1516 }
 0x145   :  { %1520 = vpow2.f32 %v506_v2  ;;  %v494_v22 = vsub.f32 %v2084_v28, %v2106_v59  ;;  %v2148_v47 = vpop.eup %1518  ;;  %v491_v28 = vsub.f32 %v2022_v45, %v2054_v7  ;;  %v520_v45 = vmul.f32 1.442695, %v493_v60 }
 0x146   :  { %1066 = vst.msk [vmem:[#allocation2 + $0x30] sm:$0xff] %vm40_vm0, %v440_v63  ;;  %1073 = vst.msk [vmem:[#allocation2 + $0x68] sm:$0xff] %vm40_vm0, %v447_v0  ;;  %vm456_vm3 = vcmp.le.f32.partialorder %v440_v63, -5e+29  ;;  %vm463_vm4 = vcmp.le.f32.partialorder %v447_v0, -5e+29 }
 0x147   :  { %v417_v12 = vpop.xlane.xlu1 %416  ;;  %v431_v58 = vpop.xlane.xlu0 %430  ;;  %v472_v15 = vsel %vm456_vm3, 0.0, %v440_v63  ;;  %v2118_v17 = vsel %vm463_vm4, 0.0, %v447_v0  ;;  %v508_v25 = vmul.f32 1.442695, %v487_v35  ;;  %v516_v59 = vmul.f32 1.442695, %v491_v28 }
 0x148   :  { %v441_v44 = vmax.f32 %v393_v3, %v417_v12  ;;  %v448_v6 = vmax.f32 %v2112_v9, %v431_v58  ;;  %562 = vperm.xlu0 %1514, %v472_v15   ;;  %v488_v18 = vsub.f32 %v392_v51, %v472_v15  ;;  %597 = vperm.xlu1 %1515, %v2118_v17   ;;  %v522_v51 = vmul.f32 1.442695, %v494_v22 }
 0x149   :  { %v495_v7 = vsub.f32 %v2102_v52, %v2118_v17 }
 0x14a   :  { %1067 = vst.msk [vmem:[#allocation2 + $0x38] sm:$0xff] %vm40_vm0, %v441_v44  ;;  %1074 = vst.msk [vmem:[#allocation2 + $0x70] sm:$0xff] %vm40_vm0, %v448_v6  ;;  %v510_v34 = vmul.f32 1.442695, %v488_v18  ;;  %vm457_vm5 = vcmp.le.f32.partialorder %v441_v44, -5e+29 }
 0x14b   :  { %vm464_vm6 = vcmp.le.f32.partialorder %v448_v6, -5e+29  ;;  %v433_v26 = vpop.xlane.xlu0 %432  ;;  %v473_v29 = vsel %vm457_vm5, 0.0, %v441_v44  ;;  %v524_v13 = vmul.f32 1.442695, %v495_v7 }
 0x14c   :  { %v2128_v30 = vsel %vm464_vm6, 0.0, %v448_v6  ;;  %1522 = vpow2.f32 %v510_v34  ;;  %v449_v61 = vmax.f32 %v2124_v24, %v433_v26  ;;  %567 = vperm.xlu0 %1514, %v473_v29   ;;  %v489_v46 = vsub.f32 %v393_v3, %v473_v29 }
 0x14d   :  { %602 = vperm.xlu1 %1515, %v2128_v30   ;;  %v496_v20 = vsub.f32 %v2112_v9, %v2128_v30  ;;  %1524 = vpow2.f32 %v502_v19 }
 0x14e   :  { %1075 = vst.msk [vmem:[#allocation2 + $0x78] sm:$0xff] %vm40_vm0, %v449_v61  ;;  %vm465_vm7 = vcmp.le.f32.partialorder %v449_v61, -5e+29  ;;  %1526 = vpow2.f32 %v514_v54  ;;  %v512_v31 = vmul.f32 1.442695, %v489_v46 }
 0x14f   :  { %v2140_v41 = vsel %vm465_vm7, 0.0, %v449_v61  ;;  %1528 = vpow2.f32 %v504_v33  ;;  %v2150_v49 = vpop.eup %1520 }
 0x150   :  { %778 = vperm.xlu0 %1514, %v2138_v37   ;;  %v497_v42 = vsub.f32 %v2124_v24, %v2140_v41  ;;  %1530 = vpow2.f32 %v518_v62 }
 0x151   :  { %607 = vperm.xlu1 %1515, %v2140_v41   ;;  %1532 = vpow2.f32 %v508_v25 }
 0x152   :  { %1534 = vpow2.f32 %v522_v51 }
 0x153   :  { %1536 = vpow2.f32 %v512_v31 }
 0x154   :  { %793 = vperm.xlu0 %1514, %v2150_v49   ;;  %1538 = vpow2.f32 %v516_v59 }
 0x155   :  { %773 = vperm.xlu1 %1515, %v2148_v47   ;;  %1540 = vpow2.f32 %v520_v45 }
 0x156   :  { %v2156_v40 = vpop.eup %1522  ;;  %1542 = vpow2.f32 %v524_v13 }
 0x157   :  { %v2158_v57 = vpop.eup %1524 }
 0x158   :  { %803 = vperm.xlu0 %1514, %v2156_v40   ;;  %v2164_v63 = vpop.eup %1526 }
 0x159   :  { %783 = vperm.xlu1 %1515, %v2158_v57   ;;  %v2166_v0 = vpop.eup %1528 }
 0x15a   :  { %v2172_v1 = vpop.eup %1530 }
 0x15b   :  { %v2174_v2 = vpop.eup %1532 }
 0x15c   :  { %813 = vperm.xlu0 %1514, %v2164_v63   ;;  %v2178_v39 = vpop.eup %1534 }
 0x15d   :  { %788 = vperm.xlu1 %1515, %v2166_v0   ;;  %v2180_v3 = vpop.eup %1536 }
 0x15e   :  { %v2184_v52 = vpop.eup %1538 }
 0x15f   :  { %v2187_v10 = vpop.eup %1540 }
 0x160   :  { %823 = vperm.xlu0 %1514, %v2172_v1   ;;  %v2190_v12 = vpop.eup %1542 }
 0x161   :  { %798 = vperm.xlu1 %1515, %v2174_v2  }
 0x164   :  { %833 = vperm.xlu0 %1514, %v2178_v39  }
 0x165   :  { %808 = vperm.xlu1 %1515, %v2180_v3  }
 0x169   :  { %818 = vperm.xlu1 %1515, %v2184_v52  }
 0x16d   :  { %828 = vperm.xlu1 %1515, %v2187_v10  }
 0x171   :  { %838 = vperm.xlu1 %1515, %v2190_v12  }
 0x1af   :  { %v533_v58 = vpop.permute.xlu1 %532 }
 0x1b0   :  { %v610_v15 = vsub.f32 %v1853_v36, %v533_v58 }
 0x1b2   :  { %v626_v17 = vmul.f32 1.442695, %v610_v15 }
 0x1b3   :  { %v538_v44 = vpop.permute.xlu1 %537  ;;  %v573_v6 = vpop.permute.xlu0 %572 }
 0x1b4   :  { %1544 = vpow2.f32 %v626_v17  ;;  %v611_v18 = vsub.f32 %v1870_v48, %v538_v44  ;;  %v618_v19 = vsub.f32 %v1879_v56, %v573_v6 }
 0x1b6   :  { %v628_v23 = vmul.f32 1.442695, %v611_v18  ;;  %v642_v34 = vmul.f32 1.442695, %v618_v19 }
 0x1b7   :  { %v578_v54 = vpop.permute.xlu1 %577  ;;  %v543_v26 = vpop.permute.xlu0 %542 }
 0x1b8   :  { %1546 = vpow2.f32 %v628_v23  ;;  %v619_v29 = vsub.f32 %v1900_v5, %v578_v54  ;;  %v612_v32 = vsub.f32 %v1905_v53, %v543_v26 }
 0x1b9   :  { %1548 = vpow2.f32 %v642_v34 }
 0x1ba   :  { %v644_v61 = vmul.f32 1.442695, %v619_v29  ;;  %v630_v36 = vmul.f32 1.442695, %v612_v32 }
 0x1bb   :  { %v583_v33 = vpop.permute.xlu1 %582  ;;  %v548_v35 = vpop.permute.xlu0 %547 }
 0x1bc   :  { %1550 = vpow2.f32 %v644_v61  ;;  %v620_v62 = vsub.f32 %v1922_v21, %v583_v33  ;;  %v613_v48 = vsub.f32 %v1926_v27, %v548_v35 }
 0x1bd   :  { %1552 = vpow2.f32 %v630_v36 }
 0x1be   :  { %v1545_v56 = vpop.eup %1544  ;;  %v646_v22 = vmul.f32 1.442695, %v620_v62  ;;  %v632_v25 = vmul.f32 1.442695, %v613_v48 }
 0x1bf   :  { %1434 = vmatprep.mubr.f32.mxu0 %v1545_v56  ;;  %v588_v46 = vpop.permute.xlu1 %587  ;;  %690 = vadd.xlane.f32.xlu0 %v1545_v56  ;;  %v553_v5 = vpop.permute.xlu0 %552 }
 0x1c0   :  { %1554 = vpow2.f32 %v646_v22  ;;  %v621_v53 = vsub.f32 %v1941_v38, %v588_v46  ;;  %v614_v51 = vsub.f32 %v1943_v43, %v553_v5  ;;  %v528_v22 = vmul.f32 1.442695, %v497_v42 }
 0x1c1   :  { %1556 = vpow2.f32 %v632_v25  ;;  %v526_v25 = vmul.f32 1.442695, %v496_v20 }
 0x1c2   :  { %v1547_v28 = vpop.eup %1546  ;;  %v648_v31 = vmul.f32 1.442695, %v621_v53  ;;  %v634_v59 = vmul.f32 1.442695, %v614_v51 }
 0x1c3   :  { %v1549_v21 = vpop.eup %1548  ;;  %1435 = vmatmul.mubr.f32.vlgmr.msra.gmra.mrb[0].mxu0 %v1547_v28  ;;  %v593_v27 = vpop.permute.xlu1 %592  ;;  %692 = vadd.xlane.f32.xlu1 %v1547_v28 }
 0x1c4   :  { %v558_v60 = vpop.permute.xlu0 %557  ;;  %1558 = vpow2.f32 %v648_v31  ;;  %v622_v45 = vsub.f32 %v1953_v55, %v593_v27  ;;  %1446 = vmatprep.mubr.f32.mxu1 %v1549_v21 }
 0x1c5   :  { %v615_v7 = vsub.f32 %v1959_v50, %v558_v60  ;;  %1560 = vpow2.f32 %v634_v59  ;;  %v658_v60 = vld [vmem:[#allocation3] sm:$0xff] }
 0x1c6   :  { %v1551_v13 = vpop.eup %1550  ;;  %v650_v38 = vmul.f32 1.442695, %v622_v45  ;;  %v674_v45 = vmul.f32 %v2148_v47, %v658_v60 }
 0x1c7   :  { %v636_v58 = vmul.f32 1.442695, %v615_v7  ;;  %v1553_v43 = vpop.eup %1552  ;;  %v598_v15 = vpop.permute.xlu1 %597  ;;  %1447 = vmatmul.mubr.f32.vlgmr.msra.gmra.mrb[0].mxu1 %v1551_v13 }
 0x1c8   :  { %v563_v17 = vpop.permute.xlu0 %562  ;;  %1562 = vpow2.f32 %v650_v38  ;;  %v623_v44 = vsub.f32 %v1968_v8, %v598_v15  ;;  %694 = vadd.xlane.f32.xlu0 %v1553_v43  ;;  %1437 = vmatprep.mubr.f32.mxu0 %v1553_v43  ;;  %v659_v38 = vld [vmem:[#allocation3 + $0x8] sm:$0xff] }
 0x1c9   :  { %v616_v6 = vsub.f32 %v1970_v11, %v563_v17  ;;  %1564 = vpow2.f32 %v636_v58  ;;  %v675_v43 = vmul.f32 %v2138_v37, %v659_v38 }
 0x1ca   :  { %v1555_v55 = vpop.eup %1554  ;;  %v652_v18 = vmul.f32 1.442695, %v623_v44  ;;  %v660_v44 = vld [vmem:[#allocation3 + $0x10] sm:$0xff] }
 0x1cb   :  { %v638_v19 = vmul.f32 1.442695, %v616_v6  ;;  %v1557_v50 = vpop.eup %1556  ;;  %1449 = vmatprep.mubr.f32.mxu1 %v1555_v55  ;;  %v676_v6 = vmul.f32 %v2158_v57, %v660_v44 }
 0x1cc   :  { %v603_v23 = vpop.permute.xlu1 %602  ;;  %v568_v34 = vpop.permute.xlu0 %567  ;;  %1566 = vpow2.f32 %v652_v18  ;;  %696 = vadd.xlane.f32.xlu0 %v1557_v50  ;;  %1438 = vmatmul.mubr.f32.gmra.mrb[2].mxu0 %v1557_v50  ;;  %v661_v18 = vld [vmem:[#allocation3 + $0x18] sm:$0xff] }
 0x1cd   :  { %v624_v54 = vsub.f32 %v1974_v14, %v603_v23  ;;  %v617_v26 = vsub.f32 %v1976_v4, %v568_v34  ;;  %1568 = vpow2.f32 %v638_v19  ;;  %v677_v47 = vmul.f32 %v2166_v0, %v661_v18  ;;  %v662_v23 = vld [vmem:[#allocation3 + $0x20] sm:$0xff] }
 0x1ce   :  { %v1559_v8 = vpop.eup %1558  ;;  %v678_v37 = vmul.f32 %v2150_v49, %v662_v23 }
 0x1cf   :  { %v654_v29 = vmul.f32 1.442695, %v624_v54  ;;  %v640_v32 = vmul.f32 1.442695, %v617_v26  ;;  %v1561_v11 = vpop.eup %1560  ;;  %1450 = vmatmul.mubr.f32.gmra.mrb[2].mxu1 %v1559_v8  ;;  %v663_v26 = vld [vmem:[#allocation3 + $0x28] sm:$0xff] }
 0x1d0   :  { %v608_v61 = vpop.permute.xlu1 %607  ;;  %698 = vadd.xlane.f32.xlu1 %v1561_v11  ;;  %1440 = vmatprep.mubr.f32.mxu0 %v1561_v11  ;;  %v2225_v24 = vpop.permute.xlu0 %778  ;;  %v679_v57 = vmul.f32 %v2174_v2, %v663_v26  ;;  %v668_v2 = vld [vmem:[#allocation3 + $0x50] sm:$0xff]  ;;  %v764_v26 = vld [vmem:[#allocation9 + $0x48] sm:$0xff] }
 0x1d1   :  { %1570 = vpow2.f32 %v654_v29  ;;  %v625_v36 = vsub.f32 %v1980_v16, %v608_v61 }
 0x1d2   :  { %1572 = vpow2.f32 %v640_v32  ;;  %v1563_v33 = vpop.eup %1562  ;;  %v664_v32 = vld [vmem:[#allocation3 + $0x30] sm:$0xff] }
 0x1d3   :  { %v656_v35 = vmul.f32 1.442695, %v625_v36  ;;  %v1565_v14 = vpop.eup %1564  ;;  %1452 = vmatprep.mubr.f32.mxu1 %v1563_v33  ;;  %v680_v0 = vmul.f32 %v2156_v40, %v664_v32  ;;  %v666_v36 = vld [vmem:[#allocation3 + $0x40] sm:$0xff]  ;;  %v684_v40 = vmul.f32 %v2172_v1, %v668_v2  ;;  %v671_v1 = vld [vmem:[#allocation3 + $0x68] sm:$0xff] }
 0x1d4   :  { %700 = vadd.xlane.f32.xlu0 %v1565_v14  ;;  %1441 = vmatmul.mubr.f32.gmra.mrb[4].mxu0 %v1565_v14  ;;  %v2221_v53 = vpop.permute.xlu1 %773  ;;  %v2229_v42 = vpop.permute.xlu0 %793  ;;  %v682_v49 = vmul.f32 %v2164_v63, %v666_v36  ;;  %v669_v63 = vld [vmem:[#allocation3 + $0x58] sm:$0xff] }
 0x1d5   :  { %1574 = vpow2.f32 %v656_v35  ;;  %v758_v36 = vld [vmem:[#allocation9 + $0x18] sm:$0xff] }
 0x1d6   :  { %v1567_v4 = vpop.eup %1566  ;;  %1576 = vpow2.f32 %v528_v22 }
 0x1d7   :  { %v1569_v62 = vpop.eup %1568  ;;  %1453 = vmatmul.mubr.f32.gmra.mrb[4].mxu1 %v1567_v4  ;;  %1578 = vpow2.f32 %v526_v25 }
 0x1d8   :  { %702 = vadd.xlane.f32.xlu1 %v1569_v62  ;;  %1443 = vmatprep.mubr.f32.mxu0 %v1569_v62  ;;  %v2223_v51 = vpop.permute.xlu1 %783  ;;  %v2233_v30 = vpop.permute.xlu0 %803 }
 0x1db   :  { %v1571_v48 = vpop.eup %1570 }
 0x1dc   :  { %v1573_v56 = vpop.eup %1572  ;;  %1455 = vmatprep.mubr.f32.mxu1 %v1571_v48  ;;  %706 = vadd.xlane.f32.xlu1 %v1549_v21  ;;  %v2227_v41 = vpop.permute.xlu1 %788 }
 0x1dd   :  { %704 = vadd.xlane.f32.xlu0 %v1573_v56  ;;  %1444 = vmatmul.mubr.f32.gmra.mrb[6].mxu0 %v1573_v56  ;;  %v2237_v28 = vpop.permute.xlu0 %813 }
 0x1df   :  { %v1575_v16 = vpop.eup %1574 }
 0x1e0   :  { %1456 = vmatmul.mubr.f32.gmra.mrb[6].mxu1 %v1575_v16  ;;  %710 = vadd.xlane.f32.xlu1 %v1555_v55  ;;  %v2215_v46 = vpop.eup %1576  ;;  %v2231_v9 = vpop.permute.xlu1 %798 }
 0x1e1   :  { %708 = vadd.xlane.f32.xlu0 %v1551_v13  ;;  %v2218_v5 = vpop.eup %1578  ;;  %v2241_v59 = vpop.permute.xlu0 %823 }
 0x1e4   :  { %714 = vadd.xlane.f32.xlu1 %v1563_v33  ;;  %v2235_v20 = vpop.permute.xlu1 %808  ;;  %v665_v33 = vld [vmem:[#allocation3 + $0x38] sm:$0xff] }
 0x1e5   :  { %712 = vadd.xlane.f32.xlu0 %v1559_v8  ;;  %v2245_v27 = vpop.permute.xlu0 %833  ;;  %v681_v14 = vmul.f32 %v2180_v3, %v665_v33 }
 0x1e8   :  { %718 = vadd.xlane.f32.xlu1 %v1571_v48  ;;  %v2239_v31 = vpop.permute.xlu1 %818  ;;  %v667_v48 = vld [vmem:[#allocation3 + $0x48] sm:$0xff] }
 0x1e9   :  { %716 = vadd.xlane.f32.xlu0 %v1567_v4  ;;  %v683_v22 = vmul.f32 %v2184_v52, %v667_v48 }
 0x1ec   :  { %v2243_v21 = vpop.permute.xlu1 %828 }
 0x1ed   :  { %720 = vadd.xlane.f32.xlu0 %v1575_v16 }
 0x1f0   :  { %v2248_v7 = vpop.permute.xlu1 %838 }
 0x1f9   :  { %848 = vperm.xlu1 %1515, %v2215_v46  }
 0x203   :  { %843 = vperm.xlu0 %1514, %v2218_v5  }
 0x24c   :  { %v691_v13 = vpop.xlane.xlu0 %690 }
 0x24d   :  { %v722_v58 = vadd.f32 %v691_v13, %v674_v45  ;;  %v670_v45 = vld [vmem:[#allocation3 + $0x60] sm:$0xff] }
 0x24e   :  { %v686_v38 = vmul.f32 %v2178_v39, %v670_v45 }
 0x24f   :  { %739 = vst.msk [vmem:[#allocation3] sm:$0xff] %vm40_vm0, %v722_v58  ;;  %v685_v58 = vmul.f32 %v2187_v10, %v669_v63  ;;  %v768_v63 = vld [vmem:[#allocation9 + $0x68] sm:$0xff] }
 0x250   :  { %v693_v15 = vpop.xlane.xlu1 %692 }
 0x251   :  { %v723_v17 = vadd.f32 %v693_v15, %v675_v43 }
 0x253   :  { %740 = vst.msk [vmem:[#allocation3 + $0x8] sm:$0xff] %vm40_vm0, %v723_v17  ;;  %v672_v17 = vld [vmem:[#allocation3 + $0x70] sm:$0xff] }
 0x255   :  { %v695_v55 = vpop.xlane.xlu0 %694 }
 0x256   :  { %v724_v19 = vadd.f32 %v695_v55, %v676_v6  ;;  %v688_v6 = vmul.f32 %v2218_v5, %v672_v17  ;;  %v687_v55 = vmul.f32 %v2190_v12, %v671_v1 }
 0x258   :  { %741 = vst.msk [vmem:[#allocation3 + $0x10] sm:$0xff] %vm40_vm0, %v724_v19 }
 0x259   :  { %v697_v50 = vpop.xlane.xlu0 %696 }
 0x25a   :  { %v725_v34 = vadd.f32 %v697_v50, %v677_v47  ;;  %v673_v47 = vld [vmem:[#allocation3 + $0x78] sm:$0xff] }
 0x25b   :  { %v689_v10 = vmul.f32 %v2215_v46, %v673_v47 }
 0x25c   :  { %742 = vst.msk [vmem:[#allocation3 + $0x18] sm:$0xff] %vm40_vm0, %v725_v34 }
 0x25d   :  { %v699_v54 = vpop.xlane.xlu1 %698 }
 0x25e   :  { %v726_v8 = vadd.f32 %v699_v54, %v678_v37  ;;  %v756_v37 = vld [vmem:[#allocation9 + $0x8] sm:$0xff]  ;;  %v755_v54 = vld [vmem:[#allocation9] sm:$0xff] }
 0x25f   :  { %v852_v5 = vmul.f32 %v2225_v24, %v756_v37  ;;  %v851_v12 = vmul.f32 %v2221_v53, %v755_v54  ;;  %v854_v53 = vmul.f32 %v2227_v41, %v758_v36  ;;  %v759_v41 = vld [vmem:[#allocation9 + $0x20] sm:$0xff] }
 0x260   :  { %743 = vst.msk [vmem:[#allocation3 + $0x20] sm:$0xff] %vm40_vm0, %v726_v8 }
 0x261   :  { %v701_v29 = vpop.xlane.xlu0 %700 }
 0x262   :  { %v727_v11 = vadd.f32 %v701_v29, %v679_v57  ;;  %v763_v57 = vld [vmem:[#allocation9 + $0x40] sm:$0xff] }
 0x263   :  { %v859_v46 = vmul.f32 %v2237_v28, %v763_v57 }
 0x264   :  { %744 = vst.msk [vmem:[#allocation3 + $0x28] sm:$0xff] %vm40_vm0, %v727_v11 }
 0x265   :  { %v703_v61 = vpop.xlane.xlu1 %702 }
 0x266   :  { %v728_v35 = vadd.f32 %v703_v61, %v680_v0  ;;  %v860_v0 = vmul.f32 %v2239_v31, %v764_v26 }
 0x268   :  { %745 = vst.msk [vmem:[#allocation3 + $0x30] sm:$0xff] %vm40_vm0, %v728_v35 }
 0x269   :  { %v707_v4 = vpop.xlane.xlu1 %706 }
 0x26a   :  { %v705_v62 = vpop.xlane.xlu0 %704  ;;  %v730_v56 = vadd.f32 %v707_v4, %v682_v49  ;;  %v757_v49 = vld [vmem:[#allocation9 + $0x10] sm:$0xff] }
 0x26b   :  { %v729_v16 = vadd.f32 %v705_v62, %v681_v14  ;;  %v766_v14 = vld [vmem:[#allocation9 + $0x58] sm:$0xff]  ;;  %v853_v4 = vmul.f32 %v2223_v51, %v757_v49  ;;  %v765_v62 = vld [vmem:[#allocation9 + $0x50] sm:$0xff] }
 0x26c   :  { %747 = vst.msk [vmem:[#allocation3 + $0x40] sm:$0xff] %vm40_vm0, %v730_v56  ;;  %v862_v28 = vmul.f32 %v2243_v21, %v766_v14 }
 0x26d   :  { %746 = vst.msk [vmem:[#allocation3 + $0x38] sm:$0xff] %vm40_vm0, %v729_v16  ;;  %v711_v25 = vpop.xlane.xlu1 %710  ;;  %v861_v16 = vmul.f32 %v2241_v59, %v765_v62  ;;  %v864_v59 = vmul.f32 %v2248_v7, %v768_v63 }
 0x26e   :  { %v709_v60 = vpop.xlane.xlu0 %708  ;;  %v732_v13 = vadd.f32 %v711_v25, %v684_v40 }
 0x26f   :  { %v731_v3 = vadd.f32 %v709_v60, %v683_v22  ;;  %v760_v22 = vld [vmem:[#allocation9 + $0x28] sm:$0xff] }
 0x270   :  { %749 = vst.msk [vmem:[#allocation3 + $0x50] sm:$0xff] %vm40_vm0, %v732_v13  ;;  %v856_v51 = vmul.f32 %v2231_v9, %v760_v22  ;;  %v855_v13 = vmul.f32 %v2229_v42, %v759_v41 }
 0x271   :  { %748 = vst.msk [vmem:[#allocation3 + $0x48] sm:$0xff] %vm40_vm0, %v731_v3  ;;  %v715_v43 = vpop.xlane.xlu1 %714  ;;  %v767_v3 = vld [vmem:[#allocation9 + $0x60] sm:$0xff] }
 0x272   :  { %v713_v15 = vpop.xlane.xlu0 %712  ;;  %v734_v44 = vadd.f32 %v715_v43, %v686_v38 }
 0x273   :  { %v733_v52 = vadd.f32 %v713_v15, %v685_v58  ;;  %v863_v15 = vmul.f32 %v2245_v27, %v767_v3 }
 0x274   :  { %751 = vst.msk [vmem:[#allocation3 + $0x60] sm:$0xff] %vm40_vm0, %v734_v44 }
 0x275   :  { %750 = vst.msk [vmem:[#allocation3 + $0x58] sm:$0xff] %vm40_vm0, %v733_v52  ;;  %v719_v18 = vpop.xlane.xlu1 %718  ;;  %v762_v52 = vld [vmem:[#allocation9 + $0x38] sm:$0xff] }
 0x276   :  { %v717_v19 = vpop.xlane.xlu0 %716  ;;  %v736_v39 = vadd.f32 %v719_v18, %v688_v6  ;;  %v761_v6 = vld [vmem:[#allocation9 + $0x30] sm:$0xff]  ;;  %v858_v18 = vmul.f32 %v2235_v20, %v762_v52 }
 0x277   :  { %v735_v50 = vadd.f32 %v717_v19, %v687_v55  ;;  %v770_v55 = vld [vmem:[#allocation9 + $0x78] sm:$0xff]  ;;  %v769_v19 = vld [vmem:[#allocation9 + $0x70] sm:$0xff]  ;;  %v857_v7 = vmul.f32 %v2233_v30, %v761_v6 }
 0x278   :  { %753 = vst.msk [vmem:[#allocation3 + $0x70] sm:$0xff] %vm40_vm0, %v736_v39 }
 0x279   :  { %752 = vst.msk [vmem:[#allocation3 + $0x68] sm:$0xff] %vm40_vm0, %v735_v50  ;;  %v849_v42 = vpop.permute.xlu1 %848 }
 0x27a   :  { %v721_v23 = vpop.xlane.xlu0 %720  ;;  %v866_v27 = vmul.f32 %v849_v42, %v770_v55 }
 0x27b   :  { %v737_v34 = vadd.f32 %v721_v23, %v689_v10 }
 0x27d   :  { %754 = vst.msk [vmem:[#allocation3 + $0x78] sm:$0xff] %vm40_vm0, %v737_v34 }
 0x282   :  { %v844_v47 = vpop.permute.xlu0 %843 }
 0x283   :  { %v865_v23 = vmul.f32 %v844_v47, %v769_v19 }
 0x296   :  { %v1436_v8 = vpop.f32.mrb[0].mxu0 }
 0x297   :  { %v1029_v29 = vadd.f32 %v1436_v8, %v852_v5  ;;  %v949_v32 = vpop.f32.mrb[1].mxu0 }
 0x298   :  { %v1028_v11 = vadd.f32 %v949_v32, %v851_v12 }
 0x299   :  { %1045 = vst [vmem:[#allocation9 + $0x8] sm:$0xff] %v1029_v29 }
 0x29a   :  { %1044 = vst [vmem:[#allocation9] sm:$0xff] %v1028_v11  ;;  %v1448_v61 = vpop.f32.mrb[0].mxu1 }
 0x29b   :  { %v1037_v33 = vadd.f32 %v1448_v61, %v860_v0  ;;  %v989_v35 = vpop.f32.mrb[1].mxu1 }
 0x29c   :  { %v1036_v24 = vadd.f32 %v989_v35, %v859_v46 }
 0x29d   :  { %1053 = vst [vmem:[#allocation9 + $0x48] sm:$0xff] %v1037_v33 }
 0x29e   :  { %1052 = vst [vmem:[#allocation9 + $0x40] sm:$0xff] %v1036_v24 }
 0x29f   :  { %v1439_v2 = vpop.f32.mrb[2].mxu0 }
 0x2a0   :  { %v1031_v31 = vadd.f32 %v1439_v2, %v854_v53  ;;  %v959_v48 = vpop.f32.mrb[3].mxu0 }
 0x2a1   :  { %v1030_v56 = vadd.f32 %v959_v48, %v853_v4 }
 0x2a2   :  { %1047 = vst [vmem:[#allocation9 + $0x18] sm:$0xff] %v1031_v31  ;;  %v1451_v40 = vpop.f32.mrb[2].mxu1 }
 0x2a3   :  { %1046 = vst [vmem:[#allocation9 + $0x10] sm:$0xff] %v1030_v56  ;;  %v1039_v25 = vadd.f32 %v1451_v40, %v862_v28  ;;  %v999_v60 = vpop.f32.mrb[3].mxu1 }
 0x2a4   :  { %v1038_v45 = vadd.f32 %v999_v60, %v861_v16 }
 0x2a5   :  { %1055 = vst [vmem:[#allocation9 + $0x58] sm:$0xff] %v1039_v25 }
 0x2a6   :  { %1054 = vst [vmem:[#allocation9 + $0x50] sm:$0xff] %v1038_v45 }
 0x2a7   :  { %v1442_v21 = vpop.f32.mrb[4].mxu0 }
 0x2a8   :  { %v1033_v38 = vadd.f32 %v1442_v21, %v856_v51  ;;  %v969_v58 = vpop.f32.mrb[5].mxu0 }
 0x2a9   :  { %v1032_v43 = vadd.f32 %v969_v58, %v855_v13 }
 0x2aa   :  { %1049 = vst [vmem:[#allocation9 + $0x28] sm:$0xff] %v1033_v38  ;;  %v1454_v17 = vpop.f32.mrb[4].mxu1 }
 0x2ab   :  { %1048 = vst [vmem:[#allocation9 + $0x20] sm:$0xff] %v1032_v43  ;;  %v1041_v1 = vadd.f32 %v1454_v17, %v864_v59  ;;  %v1009_v44 = vpop.f32.mrb[5].mxu1 }
 0x2ac   :  { %v1040_v9 = vadd.f32 %v1009_v44, %v863_v15 }
 0x2ad   :  { %1057 = vst [vmem:[#allocation9 + $0x68] sm:$0xff] %v1041_v1 }
 0x2ae   :  { %1056 = vst [vmem:[#allocation9 + $0x60] sm:$0xff] %v1040_v9 }
 0x2b0   :  { %v1445_v39 = vpop.f32.mrb[6].mxu0 }
 0x2b1   :  { %v1035_v50 = vadd.f32 %v1445_v39, %v858_v18  ;;  %v979_v10 = vpop.f32.mrb[7].mxu0 }
 0x2b2   :  { %v1034_v34 = vadd.f32 %v979_v10, %v857_v7 }
 0x2b3   :  { %v1457_v37 = vpop.f32.mrb[6].mxu1  ;;  %1051 = vst [vmem:[#allocation9 + $0x38] sm:$0xff] %v1035_v50 }
 0x2b4   :  { %v1043_v54 = vadd.f32 %v1457_v37, %v866_v27  ;;  %v1019_v5 = vpop.f32.mrb[7].mxu1  ;;  %1050 = vst [vmem:[#allocation9 + $0x30] sm:$0xff] %v1034_v34 }
 0x2b5   :  { %v1042_v12 = vadd.f32 %v1019_v5, %v865_v23 }
 0x2b6   :  { %1059 = vst [vmem:[#allocation9 + $0x78] sm:$0xff] %v1043_v54 }
 0x2b7   :  { %1058 = vst [vmem:[#allocation9 + $0x70] sm:$0xff] %v1042_v12 }
 0x2b8 PF:  { %v1081_v20 = vld [vmem:[#allocation3 + $0x10] sm:$0xff]  ;;  %v1079_v26 = vld [vmem:[#allocation3] sm:$0xff]  ;;  %v1082_v8 = vld [vmem:[#allocation3 + $0x18] sm:$0xff]  ;;  %v1668_v57 = vmov 0   ;;  %s1669_s3 = smov [#allocation9]  }
 0x2b9   :  { %1581 = vset.pattern.permute.xlu1 %v1668_v57  ;;  %1580 = vset.pattern.permute.xlu0 %v1668_v57  ;;  %v2295_v30 = vadd.f32 1e-16, %v1081_v20  ;;  %v2297_v29 = vadd.f32 1e-16, %v1079_v26  ;;  %v2299_v32 = vadd.f32 1e-16, %v1082_v8 }
 0x2ba   :  { %v1080_v11 = vld [vmem:[#allocation3 + $0x8] sm:$0xff]  ;;  %v1083_v46 = vld [vmem:[#allocation3 + $0x20] sm:$0xff]  ;;  %v1086_v35 = vld [vmem:[#allocation3 + $0x38] sm:$0xff]  ;;  %s1356_s19 = sshll.u32 %s1669_s3, 4  ;;  %s1357_s19 = int_to_ptr.vmem [resolvable:$true] %s1356_s19 }
 0x2bb   :  { %v1084_v0 = vld [vmem:[#allocation3 + $0x28] sm:$0xff]  ;;  %1582 = vrcp.f32 %v2295_v30  ;;  %v2302_v61 = vadd.f32 1e-16, %v1080_v11  ;;  %v2307_v33 = vadd.f32 1e-16, %v1083_v46  ;;  %v1085_v49 = vld [vmem:[#allocation3 + $0x30] sm:$0xff]  ;;  %p1641_p10 = scmp.lt.s32.totalorder %s1357_s19, %s1357_s19 }
 0x2bc   :  { %v2304_v36 = vadd.f32 1e-16, %v1084_v0  ;;  %1584 = vrcp.f32 %v2297_v29  ;;  %v2310_v24 = vadd.f32 1e-16, %v1086_v35  ;;  %v1088_v53 = vld [vmem:[#allocation3 + $0x48] sm:$0xff]  ;;  %v1087_v4 = vld [vmem:[#allocation3 + $0x40] sm:$0xff] }
 0x2bd   :  { %1586 = vrcp.f32 %v2299_v32  ;;  %v2313_v14 = vadd.f32 1e-16, %v1085_v49  ;;  %v1090_v62 = vld [vmem:[#allocation3 + $0x58] sm:$0xff]  ;;  %v2317_v2 = vadd.f32 1e-16, %v1088_v53  ;;  %v1089_v31 = vld [vmem:[#allocation3 + $0x50] sm:$0xff] }
 0x2be   :  { %1588 = vrcp.f32 %v2302_v61  ;;  %v2320_v48 = vadd.f32 1e-16, %v1087_v4  ;;  %v1092_v28 = vld [vmem:[#allocation3 + $0x68] sm:$0xff]  ;;  %v2323_v56 = vadd.f32 1e-16, %v1090_v62  ;;  %v1091_v16 = vld [vmem:[#allocation3 + $0x60] sm:$0xff] }
 0x2bf   :  { %1590 = vrcp.f32 %v2304_v36  ;;  %v2325_v40 = vadd.f32 1e-16, %v1089_v31  ;;  %v1094_v22 = vld [vmem:[#allocation3 + $0x78] sm:$0xff]  ;;  %v2328_v25 = vadd.f32 1e-16, %v1092_v28  ;;  %v1093_v60 = vld [vmem:[#allocation3 + $0x70] sm:$0xff] }
 0x2c0   :  { %1592 = vrcp.f32 %v2307_v33  ;;  %v2331_v45 = vadd.f32 1e-16, %v1091_v16  ;;  %v2335_v13 = vadd.f32 1e-16, %v1094_v22  ;;  %v2339_v38 = vadd.f32 1e-16, %v1093_v60 }
 0x2c1   :  { %1594 = vrcp.f32 %v2310_v24  ;;  %s1636_s20 = scalar_lea.vmem %s1357_s19, 2048 }
 0x2c2   :  { %1596 = vrcp.f32 %v2313_v14  ;;  %p1637_p9 = scmp.ne.s32.totalorder %s1357_s19, %s1636_s20  ;;  %p1642_p11 = scmp.lt.s32.totalorder %s1636_s20, %s1636_s20 }
 0x2c3   :  { %1598 = vrcp.f32 %v2317_v2 }
 0x2c4   :  { %1600 = vrcp.f32 %v2320_v48  ;;  %p1643_p12 = por %p1642_p11, %p1641_p10 }
 0x2c5   :  { %v1583_v41 = vpop.eup %1582  ;;  %1602 = vrcp.f32 %v2323_v56 }
 0x2c6   :  { %v1585_v51 = vpop.eup %1584  ;;  %v1129_v63 = vmul.f32 %v1583_v41, %v2295_v30  ;;  %1604 = vrcp.f32 %v2325_v40  ;;  %p1644_p13 = pnand %p1643_p12, %p1637_p9 }
 0x2c7   :  { %v1587_v3 = vpop.eup %1586  ;;  %v1127_v21 = vmul.f32 %v1585_v51, %v2297_v29  ;;  %1606 = vrcp.f32 %v2328_v25 }
 0x2c8   :  { %v1589_v58 = vpop.eup %1588  ;;  %v1145_v59 = vsub.f32 2.0, %v1129_v63  ;;  %v1130_v43 = vmul.f32 %v1587_v3, %v2299_v32  ;;  %1608 = vrcp.f32 %v2331_v45 }
 0x2c9   :  { %v1591_v15 = vpop.eup %1590  ;;  %v1143_v17 = vsub.f32 2.0, %v1127_v21  ;;  %v1128_v1 = vmul.f32 %v1589_v58, %v2302_v61  ;;  %1610 = vrcp.f32 %v2335_v13 }
 0x2ca   :  { %v1593_v44 = vpop.eup %1592  ;;  %v1161_v52 = vmul.f32 %v1583_v41, %v1145_v59  ;;  %v1146_v9 = vsub.f32 2.0, %v1130_v43  ;;  %v1132_v6 = vmul.f32 %v1591_v15, %v2304_v36  ;;  %1612 = vrcp.f32 %v2339_v38 }
 0x2cb   :  { %v1595_v55 = vpop.eup %1594  ;;  %v1159_v42 = vmul.f32 %v1585_v51, %v1143_v17  ;;  %v1144_v18 = vsub.f32 2.0, %v1128_v1  ;;  %v1131_v19 = vmul.f32 %v1593_v44, %v2307_v33 }
 0x2cc   :  { %v1597_v47 = vpop.eup %1596  ;;  %v1177_v7 = vmul.f32 %v1161_v52, %v2295_v30  ;;  %v1162_v39 = vmul.f32 %v1587_v3, %v1146_v9  ;;  %v1148_v27 = vsub.f32 2.0, %v1132_v6  ;;  %v1134_v50 = vmul.f32 %v1595_v55, %v2310_v24 }
 0x2cd   :  { %v1175_v10 = vmul.f32 %v1159_v42, %v2297_v29  ;;  %v1160_v23 = vmul.f32 %v1589_v58, %v1144_v18  ;;  %v1147_v34 = vsub.f32 2.0, %v1131_v19  ;;  %v1133_v37 = vmul.f32 %v1597_v47, %v2313_v14  ;;  %v1599_v54 = vpop.eup %1598 }
 0x2ce   :  { %v1193_v5 = vsub.f32 2.0, %v1177_v7  ;;  %v1178_v12 = vmul.f32 %v1162_v39, %v2299_v32  ;;  %v1164_v20 = vmul.f32 %v1591_v15, %v1148_v27  ;;  %v1150_v26 = vsub.f32 2.0, %v1134_v50  ;;  %v1601_v8 = vpop.eup %1600 }
 0x2cf   :  { %v1191_v57 = vsub.f32 2.0, %v1175_v10  ;;  %v1176_v30 = vmul.f32 %v1160_v23, %v2302_v61  ;;  %v1163_v11 = vmul.f32 %v1593_v44, %v1147_v34  ;;  %v1149_v0 = vsub.f32 2.0, %v1133_v37  ;;  %v1603_v46 = vpop.eup %1602 }
 0x2d0   :  { %v1209_v35 = vmul.f32 %v1193_v5, %v1161_v52  ;;  %v1194_v49 = vsub.f32 2.0, %v1178_v12  ;;  %v1180_v29 = vmul.f32 %v1164_v20, %v2304_v36  ;;  %v1166_v53 = vmul.f32 %v1595_v55, %v1150_v26  ;;  %v1605_v4 = vpop.eup %1604 }
 0x2d1   :  { %v1207_v62 = vmul.f32 %v1191_v57, %v1159_v42  ;;  %v1192_v31 = vsub.f32 2.0, %v1176_v30  ;;  %v1179_v28 = vmul.f32 %v1163_v11, %v2307_v33  ;;  %v1165_v32 = vmul.f32 %v1597_v47, %v1149_v0  ;;  %v1607_v16 = vpop.eup %1606 }
 0x2d2   :  { %1251 = vperm.xlu1 %1581, %v1209_v35   ;;  %v1210_v22 = vmul.f32 %v1194_v49, %v1162_v39  ;;  %v1196_v60 = vsub.f32 2.0, %v1180_v29  ;;  %v1182_v61 = vmul.f32 %v1166_v53, %v2310_v24  ;;  %v1136_v41 = vmul.f32 %v1599_v54, %v2317_v2  ;;  %v1609_v51 = vpop.eup %1608 }
 0x2d3   :  { %1241 = vperm.xlu0 %1580, %v1207_v62   ;;  %v1208_v63 = vmul.f32 %v1192_v31, %v1160_v23  ;;  %v1195_v3 = vsub.f32 2.0, %v1179_v28  ;;  %v1181_v36 = vmul.f32 %v1165_v32, %v2313_v14  ;;  %v1135_v21 = vmul.f32 %v1601_v8, %v2320_v48  ;;  %v1611_v58 = vpop.eup %1610 }
 0x2d4   :  { %v1212_v59 = vmul.f32 %v1196_v60, %v1164_v20  ;;  %v1198_v33 = vsub.f32 2.0, %v1182_v61  ;;  %v1152_v43 = vsub.f32 2.0, %v1136_v41  ;;  %v1138_v15 = vmul.f32 %v1603_v46, %v2323_v56  ;;  %v1613_v17 = vpop.eup %1612  ;;  %v1225_v60 = vld [vmem:[#allocation9 + $0x10] sm:$0xff]  ;;  %v1223_v61 = vld [vmem:[#allocation9] sm:$0xff] }
 0x2d5   :  { %v1211_v1 = vmul.f32 %v1195_v3, %v1163_v11  ;;  %v1197_v44 = vsub.f32 2.0, %v1181_v36  ;;  %v1151_v24 = vsub.f32 2.0, %v1135_v21  ;;  %v1137_v52 = vmul.f32 %v1605_v4, %v2325_v40  ;;  %v1226_v3 = vld [vmem:[#allocation9 + $0x18] sm:$0xff] }
 0x2d6   :  { %1256 = vperm.xlu1 %1581, %v1210_v22   ;;  %v1214_v9 = vmul.f32 %v1198_v33, %v1166_v53  ;;  %v1168_v6 = vmul.f32 %v1599_v54, %v1152_v43  ;;  %v1154_v55 = vsub.f32 2.0, %v1138_v15  ;;  %v1140_v14 = vmul.f32 %v1607_v16, %v2328_v25  ;;  %v1228_v33 = vld [vmem:[#allocation9 + $0x28] sm:$0xff]  ;;  %v1227_v43 = vld [vmem:[#allocation9 + $0x20] sm:$0xff] }
 0x2d7   :  { %1246 = vperm.xlu0 %1580, %v1208_v63   ;;  %v1213_v42 = vmul.f32 %v1197_v44, %v1165_v32  ;;  %v1167_v18 = vmul.f32 %v1601_v8, %v1151_v24  ;;  %v1153_v19 = vsub.f32 2.0, %v1137_v52  ;;  %v1139_v47 = vmul.f32 %v1609_v51, %v2331_v45  ;;  %v1230_v24 = vld [vmem:[#allocation9 + $0x38] sm:$0xff]  ;;  %v1229_v52 = vld [vmem:[#allocation9 + $0x30] sm:$0xff] }
 0x2d8   :  { %v1184_v7 = vmul.f32 %v1168_v6, %v2317_v2  ;;  %v1170_v39 = vmul.f32 %v1603_v46, %v1154_v55  ;;  %v1156_v27 = vsub.f32 2.0, %v1140_v14  ;;  %v1142_v50 = vmul.f32 %v1611_v58, %v2335_v13 }
 0x2d9   :  { %v1183_v10 = vmul.f32 %v1167_v18, %v2320_v48  ;;  %v1169_v23 = vmul.f32 %v1605_v4, %v1153_v19  ;;  %v1155_v34 = vsub.f32 2.0, %v1139_v47  ;;  %v1141_v37 = vmul.f32 %v1613_v17, %v2339_v38 }
 0x2da   :  { %1266 = vperm.xlu1 %1581, %v1212_v59   ;;  %v1200_v54 = vsub.f32 2.0, %v1184_v7  ;;  %v1186_v5 = vmul.f32 %v1170_v39, %v2323_v56  ;;  %v1172_v12 = vmul.f32 %v1607_v16, %v1156_v27  ;;  %v1158_v20 = vsub.f32 2.0, %v1142_v50  ;;  %v1234_v27 = vld [vmem:[#allocation9 + $0x58] sm:$0xff]  ;;  %v1233_v50 = vld [vmem:[#allocation9 + $0x50] sm:$0xff] }
 0x2db   :  { %1261 = vperm.xlu0 %1580, %v1211_v1   ;;  %v1199_v26 = vsub.f32 2.0, %v1183_v10  ;;  %v1185_v2 = vmul.f32 %v1169_v23, %v2325_v40  ;;  %v1171_v8 = vmul.f32 %v1609_v51, %v1155_v34  ;;  %v1157_v57 = vsub.f32 2.0, %v1141_v37 }
 0x2dc   :  { %v1216_v30 = vmul.f32 %v1200_v54, %v1168_v6  ;;  %v1202_v11 = vsub.f32 2.0, %v1186_v5  ;;  %v1188_v48 = vmul.f32 %v1172_v12, %v2328_v25  ;;  %v1174_v0 = vmul.f32 %v1611_v58, %v1158_v20  ;;  %v1236_v54 = vld [vmem:[#allocation9 + $0x68] sm:$0xff]  ;;  %v1235_v5 = vld [vmem:[#allocation9 + $0x60] sm:$0xff] }
 0x2dd   :  { %v1215_v46 = vmul.f32 %v1199_v26, %v1167_v18  ;;  %v1201_v35 = vsub.f32 2.0, %v1185_v2  ;;  %v1187_v49 = vmul.f32 %v1171_v8, %v2331_v45  ;;  %v1173_v56 = vmul.f32 %v1613_v17, %v1157_v57  ;;  %v1231_v18 = vld [vmem:[#allocation9 + $0x40] sm:$0xff]  ;;  %v1237_v57 = vld [vmem:[#allocation9 + $0x70] sm:$0xff] }
 0x2de   :  { %1276 = vperm.xlu1 %1581, %v1214_v9   ;;  %v1218_v29 = vmul.f32 %v1202_v11, %v1170_v39  ;;  %v1204_v53 = vsub.f32 2.0, %v1188_v48  ;;  %v1190_v4 = vmul.f32 %v1174_v0, %v2335_v13 }
 0x2df   :  { %1271 = vperm.xlu0 %1580, %v1213_v42   ;;  %v1217_v40 = vmul.f32 %v1201_v35, %v1169_v23  ;;  %v1203_v62 = vsub.f32 2.0, %v1187_v49  ;;  %v1189_v31 = vmul.f32 %v1173_v56, %v2339_v38  ;;  %v1224_v38 = vld [vmem:[#allocation9 + $0x8] sm:$0xff] }
 0x2e0   :  { %v1220_v28 = vmul.f32 %v1204_v53, %v1172_v12  ;;  %v1206_v25 = vsub.f32 2.0, %v1190_v4  ;;  %v1232_v42 = vld [vmem:[#allocation9 + $0x48] sm:$0xff] }
 0x2e1   :  { %v1219_v32 = vmul.f32 %v1203_v62, %v1171_v8  ;;  %v1205_v16 = vsub.f32 2.0, %v1189_v31  ;;  %v1238_v8 = vld [vmem:[#allocation9 + $0x78] sm:$0xff] }
 0x2e2   :  { %1286 = vperm.xlu1 %1581, %v1216_v30   ;;  %v1222_v22 = vmul.f32 %v1206_v25, %v1174_v0 }
 0x2e3   :  { %1281 = vperm.xlu0 %1580, %v1215_v46   ;;  %v1221_v45 = vmul.f32 %v1205_v16, %v1173_v56 }
 0x2e6   :  { %1296 = vperm.xlu1 %1581, %v1218_v29  }
 0x2e7   :  { %1291 = vperm.xlu0 %1580, %v1217_v40  }
 0x2ea   :  { %1306 = vperm.xlu1 %1581, %v1220_v28  }
 0x2eb   :  { %1301 = vperm.xlu0 %1580, %v1219_v32  }
 0x2ee   :  { %1316 = vperm.xlu1 %1581, %v1222_v22  }
 0x2ef   :  { %1311 = vperm.xlu0 %1580, %v1221_v45  }
 0x351   :  { %v1252_v13 = vpop.permute.xlu1 %1251 }
 0x352   :  { %v1321_v41 = vmul.f32 %v1252_v13, %v1225_v60  ;;  %v1242_v51 = vpop.permute.xlu0 %1241 }
 0x353   :  { %v1319_v63 = vmul.f32 %v1242_v51, %v1223_v61 }
 0x354   :  { %1337 = vst [vmem:[#allocation9 + $0x10] sm:$0xff] %v1321_v41 }
 0x355   :  { %1335 = vst [vmem:[#allocation9] sm:$0xff] %v1319_v63  ;;  %v1257_v36 = vpop.permute.xlu1 %1256 }
 0x356   :  { %v1322_v21 = vmul.f32 %v1257_v36, %v1226_v3  ;;  %v1247_v58 = vpop.permute.xlu0 %1246 }
 0x357   :  { %v1320_v59 = vmul.f32 %v1247_v58, %v1224_v38 }
 0x358   :  { %1338 = vst [vmem:[#allocation9 + $0x18] sm:$0xff] %v1322_v21 }
 0x359   :  { %1336 = vst [vmem:[#allocation9 + $0x8] sm:$0xff] %v1320_v59  ;;  %v1267_v15 = vpop.permute.xlu1 %1266 }
 0x35a   :  { %v1324_v17 = vmul.f32 %v1267_v15, %v1228_v33  ;;  %v1262_v1 = vpop.permute.xlu0 %1261 }
 0x35b   :  { %v1323_v44 = vmul.f32 %v1262_v1, %v1227_v43 }
 0x35c   :  { %1340 = vst [vmem:[#allocation9 + $0x28] sm:$0xff] %v1324_v17 }
 0x35d   :  { %1339 = vst [vmem:[#allocation9 + $0x20] sm:$0xff] %v1323_v44  ;;  %v1277_v9 = vpop.permute.xlu1 %1276 }
 0x35e   :  { %v1326_v6 = vmul.f32 %v1277_v9, %v1230_v24  ;;  %v1272_v55 = vpop.permute.xlu0 %1271 }
 0x35f   :  { %v1325_v14 = vmul.f32 %v1272_v55, %v1229_v52 }
 0x360   :  { %1342 = vst [vmem:[#allocation9 + $0x38] sm:$0xff] %v1326_v6 }
 0x361   :  { %1341 = vst [vmem:[#allocation9 + $0x30] sm:$0xff] %v1325_v14  ;;  %v1287_v19 = vpop.permute.xlu1 %1286 }
 0x362   :  { %v1328_v47 = vmul.f32 %v1287_v19, %v1232_v42  ;;  %v1282_v7 = vpop.permute.xlu0 %1281 }
 0x363   :  { %v1327_v39 = vmul.f32 %v1282_v7, %v1231_v18 }
 0x364   :  { %1344 = vst [vmem:[#allocation9 + $0x48] sm:$0xff] %v1328_v47 }
 0x365   :  { %1343 = vst [vmem:[#allocation9 + $0x40] sm:$0xff] %v1327_v39  ;;  %v1297_v10 = vpop.permute.xlu1 %1296 }
 0x366   :  { %v1330_v23 = vmul.f32 %v1297_v10, %v1234_v27  ;;  %v1292_v34 = vpop.permute.xlu0 %1291 }
 0x367   :  { %v1329_v37 = vmul.f32 %v1292_v34, %v1233_v50 }
 0x368   :  { %1346 = vst [vmem:[#allocation9 + $0x58] sm:$0xff] %v1330_v23 }
 0x369   :  { %1345 = vst [vmem:[#allocation9 + $0x50] sm:$0xff] %v1329_v37  ;;  %v1307_v12 = vpop.permute.xlu1 %1306 }
 0x36a   :  { %v1332_v20 = vmul.f32 %v1307_v12, %v1236_v54  ;;  %v1302_v26 = vpop.permute.xlu0 %1301 }
 0x36b   :  { %v1331_v2 = vmul.f32 %v1302_v26, %v1235_v5 }
 0x36c   :  { %1348 = vst [vmem:[#allocation9 + $0x68] sm:$0xff] %v1332_v20 }
 0x36d   :  { %1347 = vst [vmem:[#allocation9 + $0x60] sm:$0xff] %v1331_v2  ;;  %v1317_v30 = vpop.permute.xlu1 %1316 }
 0x36e   :  { %v1334_v11 = vmul.f32 %v1317_v30, %v1238_v8  ;;  %v1312_v48 = vpop.permute.xlu0 %1311 }
 0x36f   :  { %v1333_v0 = vmul.f32 %v1312_v48, %v1237_v57 }
 0x370   :  { %1350 = vst [vmem:[#allocation9 + $0x78] sm:$0xff] %v1334_v11 }
 0x371   :  { %1349 = vst [vmem:[#allocation9 + $0x70] sm:$0xff] %v1333_v0 }
 0x372   :  { %1647 = shalt.err (!%p1644_p13)
}
 0x373   :  { %s1648_s23 = scalar_lea.hbm %s2395_s5, 2048 }
 0x374   :  { %p1649_p0 = scmp.ne.s32.totalorder %s2395_s5, %s1648_s23  ;;  %p1652_p1 = scmp.lt.u32.totalorder %s1648_s23, %s2395_s5 }
 0x376   :  { %p1654_p2 = pnand %p1652_p1, %p1649_p0 }
 0x378   :  { %1657 = shalt.err (!%p1654_p2)
}
 0x379   :  { %1362 = dma.vmem_to_hbm [thread:$0]  %s1357_s19, 2048, %s2395_s5, [#allocation8], %s1663_s28, %s1663_s28, %s1664_s29  }
 0x37a   :  { %1660 = dma.done.wait [#allocation8], 2048  }
 0x37b   :  { %1661 = vsyncadd [#allocation8], 4294965248 }
 0x37c   :  { %1366 = vsyncpa [#allocation7], 1 }
 0x37d   :  { %1367 = vsyncpa [#allocation8], 1 }

</bundles_post_ra>
